<compile_context>
chip_gen: v5e
topology: v5e:2x2
jax: 0.10.0
libtpu: 0.0.40
codegen_flags: <defaults>
</compile_context>

<pallas_src>
import jax
import jax.numpy as jnp
from jax import lax
from jax.experimental import pallas as pl
from jax.experimental.pallas import tpu as pltpu

# ---------------- configuration (small, consistent with the module) ----------
N, C, H, W = 2, 7, 16, 16          # in_chans = 7 (DAMA default)
P_SIZE = 4                         # patch size
L = (H // P_SIZE) * (W // P_SIZE)  # 16 patches per image
PATCH_DIM = P_SIZE * P_SIZE * C    # 112 (true per-patch feature dim)
LANE_PAD = 128                     # lane-dense padded patch-feature dim
EMBED_DIM = 32
HIDDEN_DIM = 2 * EMBED_DIM         # 64
LEN_KEEP = L // 2                  # visible tokens per image
TOKENS = N * LEN_KEEP              # rows fed to the projection head (16)
LAST_K_BLOCKS = 6
LOSS_BETA = 2.0
LOSS_ALPHA = 1.0
LN_EPS = 1e-5

ROWS = N * L                       # 32 patch rows
OUT1_ROWS = ROWS + 8               # lpp rows + aligned scalar-loss row block

# packed projection-parameter slab layout (see make_proj_params)
_W1_ROW = 0                        # rows [0, 32),  cols [0, 64): w1 (D, 2D)
_W2_ROW = EMBED_DIM                # rows [32, 96), cols [0, 32): w2 (2D, D)
_VEC_ROW = EMBED_DIM + HIDDEN_DIM  # rows 96..101: b1, g1, be1, b2, g2, be2
PROJ_ROWS = _VEC_ROW + 8           # 104 (sublane-aligned), cols = 64

_VMEM = pltpu.MemorySpace.VMEM


# ---------------- Pallas kernel 1: student masked reconstruction loss --------
def _recon_loss_kernel(pred_ref, target_ref, mask_ref, out_ref):
    # pred/target: (ROWS, 128) f32; lanes [PATCH_DIM:128] are zero in BOTH.
    diff = pred_ref[...] - target_ref[...]
    # per-patch mean over the TRUE feature dim (112), not the padded 128.
    lpp = jnp.sum(diff * diff, axis=-1, keepdims=True) * (1.0 / PATCH_DIM)  # (ROWS, 1)
    mask = mask_ref[...]                                     # (ROWS, 1)
    num = jnp.sum(lpp * mask, keepdims=True)                 # (1, 1)
    den = jnp.maximum(jnp.sum(mask, keepdims=True), 1.0)     # mask.sum() > 0 always
    loss = num * pl.reciprocal(den)                          # (1, 1)
    # single merged output: rows 0:ROWS = lpp, rows ROWS:ROWS+8 = scalar loss.
    out_ref[0:ROWS, :] = lpp
    out_ref[ROWS:OUT1_ROWS, :] = jnp.broadcast_to(loss, (8, 1))


def recon_loss(pred_flat, target_pad, mask):
    out = pl.pallas_call(
        _recon_loss_kernel,
        out_shape=jax.ShapeDtypeStruct((OUT1_ROWS, 1), jnp.float32),
        in_specs=[pl.BlockSpec(memory_space=_VMEM)] * 3,
        out_specs=pl.BlockSpec(memory_space=_VMEM),
    )(pred_flat, target_pad, mask.reshape(ROWS, 1))
    loss = out[ROWS, 0]
    lpp = out[0:ROWS, 0].reshape(N, L)
    return loss, lpp


# ------ Pallas kernel 2: fused teacher recon loss + info (regression) loss ---
def _teacher_fused_kernel(pred_ref, target_ref, mask_ref, x_ref, p_ref, y_ref,
                          out_ref):
    # ---- teacher masked reconstruction loss (same math as kernel 1) ----
    diff = pred_ref[...] - target_ref[...]                   # (ROWS, 128)
    lpp = jnp.sum(diff * diff, axis=-1, keepdims=True) * (1.0 / PATCH_DIM)
    mask = mask_ref[...]
    num = jnp.sum(lpp * mask, keepdims=True)
    den = jnp.maximum(jnp.sum(mask, keepdims=True), 1.0)
    recon = num * pl.reciprocal(den)                         # (1, 1)

    # ---- unpack the packed projection-head parameter slab (one load) ----
    P = p_ref[...]                                           # (104, 64)
    w1 = P[_W1_ROW:_W1_ROW + EMBED_DIM, :]                   # (32, 64)
    w2 = P[_W2_ROW:_W2_ROW + HIDDEN_DIM, 0:EMBED_DIM]        # (64, 32)
    b1 = P[_VEC_ROW + 0:_VEC_ROW + 1, :]                     # (1, 64)
    g1 = P[_VEC_ROW + 1:_VEC_ROW + 2, :]
    be1 = P[_VEC_ROW + 2:_VEC_ROW + 3, :]
    b2 = P[_VEC_ROW + 3:_VEC_ROW + 4, 0:EMBED_DIM]           # (1, 32)
    g2 = P[_VEC_ROW + 4:_VEC_ROW + 5, 0:EMBED_DIM]
    be2 = P[_VEC_ROW + 5:_VEC_ROW + 6, 0:EMBED_DIM]

    # ---- projection head on student visible tokens ----
    # Linear -> LayerNorm -> ReLU -> Linear -> LayerNorm -> ReLU -> Softmax
    x = x_ref[...]                                           # (TOKENS, D) f32
    h = jnp.dot(x, w1, preferred_element_type=jnp.float32) + b1
    mu = jnp.mean(h, axis=-1, keepdims=True)
    var = jnp.mean((h - mu) ** 2, axis=-1, keepdims=True)
    h = (h - mu) * lax.rsqrt(var + LN_EPS) * g1 + be1
    h = jnp.maximum(h, 0.0)

    h = jnp.dot(h, w2, preferred_element_type=jnp.float32) + b2
    mu = jnp.mean(h, axis=-1, keepdims=True)
    var = jnp.mean((h - mu) ** 2, axis=-1, keepdims=True)
    h = (h - mu) * lax.rsqrt(var + LN_EPS) * g2 + be2
    h = jnp.maximum(h, 0.0)

    h = h - jnp.max(h, axis=-1, keepdims=True)               # softmax(dim=-1)
    e = jnp.exp(h)
    xs = e * pl.reciprocal(jnp.sum(e, axis=-1, keepdims=True), approx=True)

    # ---- teacher features: LayerNorm on flat (K*T, D), mean over K, softmax ----
    y = y_ref[...]                                           # (K*TOKENS, D) f32
    ymu = jnp.mean(y, axis=-1, keepdims=True)
    yvar = jnp.mean((y - ymu) ** 2, axis=-1, keepdims=True)
    yn = (y - ymu) * lax.rsqrt(yvar + LN_EPS)
    ym = yn[0:TOKENS, :]
    for k in range(1, LAST_K_BLOCKS):                        # static unrolled K-sum
        ym = ym + yn[k * TOKENS:(k + 1) * TOKENS, :]
    ym = ym * (1.0 / LAST_K_BLOCKS)
    ym = ym - jnp.max(ym, axis=-1, keepdims=True)
    ye = jnp.exp(ym)
    ys = ye * pl.reciprocal(jnp.sum(ye, axis=-1, keepdims=True), approx=True)

    # ---- smooth L1 (beta=LOSS_BETA, reduction='none'), sum over all, * alpha ----
    d = xs - ys
    ad = jnp.abs(d)
    sl1 = jnp.where(ad < LOSS_BETA, (0.5 / LOSS_BETA) * d * d, ad - 0.5 * LOSS_BETA)
    info = jnp.sum(sl1, keepdims=True) * LOSS_ALPHA          # (1, 1)

    # single merged (1, 2) output: lane 0 = teacher recon loss, lane 1 = info.
    lane = lax.broadcasted_iota(jnp.int32, (1, 2), 1)
    out_ref[...] = jnp.where(lane == 0,
                             jnp.broadcast_to(recon, (1, 2)),
                             jnp.broadcast_to(info, (1, 2)))


def teacher_losses(pred_txt_flat, target_pad, mask_txt, x_tokens, proj_slab, y_flat):
    out = pl.pallas_call(
        _teacher_fused_kernel,
        out_shape=jax.ShapeDtypeStruct((1, 2), jnp.float32),
        in_specs=[pl.BlockSpec(memory_space=_VMEM)] * 6,
        out_specs=pl.BlockSpec(memory_space=_VMEM),
    )(pred_txt_flat, target_pad, mask_txt.reshape(ROWS, 1),
      x_tokens, proj_slab, y_flat)
    return out[0, 0], out[0, 1]


# ---------------- plain-JAX glue (reshapes / parameter setup) -----------------
def patchify(imgs):
    n = imgs.shape[0]
    h = w = imgs.shape[2] // P_SIZE
    x = imgs.reshape(n, C, h, P_SIZE, w, P_SIZE)
    x = jnp.einsum('nchpwq->nhwpqc', x)
    return x.reshape(n, h * w, P_SIZE * P_SIZE * C)


def _pad_flatten_target(x):
    """(n, l, PATCH_DIM) -> lane-dense (n*l, 128) with zero padding (target only)."""
    n, l, d = x.shape
    x = jnp.pad(x, ((0, 0), (0, 0), (0, LANE_PAD - d)))
    return x.reshape(n * l, LANE_PAD)


# TODO(synk): the real base_encoder / momentum_encoder are external ViT-MAE
# backbones passed into DAMA.__init__; replaced by a minimal deterministic JAX
# stub with the same interface (pred, x, mask, featout, ids_shuffle, ids_restore).
def make_encoder_params(key):
    k1, k2 = jax.random.split(key)
    w_embed = jax.random.normal(k1, (PATCH_DIM, EMBED_DIM), jnp.float32) * 0.02
    w_dec_core = jax.random.normal(k2, (EMBED_DIM, PATCH_DIM), jnp.float32) * 0.02
    # zero-pad the decoder output dim 112 -> 128 so the producing einsum emits a
    # lane-dense (N, L, 128) pred with exactly-zero padded lanes (no wrapper pad pass).
    w_dec = jnp.pad(w_dec_core, ((0, 0), (0, LANE_PAD - PATCH_DIM)))
    return w_embed, w_dec


def stub_encoder(params, imgs, mask_in, loss_per_patch_in, return_feat, noise_key):
    del mask_in  # interface parity with base_encoder(imgs, mask, lpp, return_feat)
    w_embed, w_dec = params
    patches = patchify(imgs)                                 # (N, L, PATCH_DIM)
    tokens = jnp.einsum('nlp,pd->nld', patches, w_embed)     # (N, L, D)

    if loss_per_patch_in is None:
        noise = jax.random.uniform(noise_key, (N, L))
    else:
        noise = -loss_per_patch_in   # loss-guided sampling in the momentum branch
    ids_shuffle = jnp.argsort(noise, axis=1)
    ids_restore = jnp.argsort(ids_shuffle, axis=1)
    ids_keep = ids_shuffle[:, :LEN_KEEP]
    idx = jnp.broadcast_to(ids_keep[:, :, None], (N, LEN_KEEP, EMBED_DIM))
    x_vis = jnp.take_along_axis(tokens, idx, axis=1)         # (N, keep, D)

    mask = jnp.ones((N, L), jnp.float32)
    mask = mask.at[:, :LEN_KEEP].set(0.0)
    mask = jnp.take_along_axis(mask, ids_restore, axis=1)    # 0 keep, 1 remove

    # pred lanes [PATCH_DIM:128] are exactly zero (w_dec padded columns are zero).
    pred = jnp.einsum('nld,dp->nlp', tokens, w_dec)          # (N, L, 128)

    featout = None
    if return_feat:
        featout = [x_vis * (1.0 + 0.05 * k) + 0.01 * k
                   for k in range(LAST_K_BLOCKS + 2)]
    return pred, x_vis, mask, featout, ids_shuffle, ids_restore


def make_proj_params(key):
    """Projection head params packed into ONE zero-padded (104, 64) slab."""
    k1, k2 = jax.random.split(key)
    d, d2 = EMBED_DIM, HIDDEN_DIM
    w1 = jax.random.normal(k1, (d, d2), jnp.float32) * 0.02
    w2 = jax.random.normal(k2, (d2, d), jnp.float32) * 0.02
    b1 = jnp.zeros((d2,), jnp.float32)
    g1 = jnp.ones((d2,), jnp.float32)        # nn.LayerNorm init
    be1 = jnp.zeros((d2,), jnp.float32)
    b2 = jnp.zeros((d,), jnp.float32)
    g2 = jnp.ones((d,), jnp.float32)
    be2 = jnp.zeros((d,), jnp.float32)

    slab = jnp.zeros((PROJ_ROWS, d2), jnp.float32)
    slab = slab.at[_W1_ROW:_W1_ROW + d, :].set(w1)
    slab = slab.at[_W2_ROW:_W2_ROW + d2, 0:d].set(w2)
    slab = slab.at[_VEC_ROW + 0, :].set(b1)
    slab = slab.at[_VEC_ROW + 1, :].set(g1)
    slab = slab.at[_VEC_ROW + 2, :].set(be1)
    slab = slab.at[_VEC_ROW + 3, 0:d].set(b2)
    slab = slab.at[_VEC_ROW + 4, 0:d].set(g2)
    slab = slab.at[_VEC_ROW + 5, 0:d].set(be2)
    return slab


def dama_forward(imgs, params):
    base_p, mom_p, proj_slab = params

    # patchified target (norm_pix_loss=False), padded/flattened once, reused by
    # both kernels.  Preds arrive already lane-dense from the stub decoder.
    target_pad = _pad_flatten_target(patchify(imgs))          # (ROWS, 128)

    # student branch ("img")
    pred_img, x_img, mask_img, _, _, _ = stub_encoder(
        base_p, imgs, None, None, False, jax.random.PRNGKey(1))
    recons_img, lpp_img = recon_loss(
        pred_img.reshape(ROWS, LANE_PAD), target_pad, mask_img)

    # teacher branch ("txt"), loss-guided sampling (needs lpp_img, so the
    # student recon kernel cannot fuse with the teacher-side kernel)
    pred_txt, _, mask_txt, featout_txt, _, _ = stub_encoder(
        mom_p, imgs, mask_img, lpp_img, True, jax.random.PRNGKey(2))

    # fused teacher recon loss + mutual-information regression loss
    feats = featout_txt[-LAST_K_BLOCKS:]
    y_flat = jnp.concatenate([f.reshape(-1, EMBED_DIM) for f in feats], axis=0)  # (K*T, D)
    x_flat = x_img.reshape(-1, EMBED_DIM)                                         # (T, D)
    recons_txt, info = teacher_losses(
        pred_txt.reshape(ROWS, LANE_PAD), target_pad, mask_txt,
        x_flat, proj_slab, y_flat)

    # NOTE: returned preds are lane-padded to 128; true values are [..., :PATCH_DIM].
    return info, recons_img, recons_txt, pred_img, mask_img, pred_txt, mask_txt


if __name__ == "__main__":
    key = jax.random.PRNGKey(0)
    k_img, k_base, k_mom, k_proj = jax.random.split(key, 4)
    imgs = jax.random.normal(k_img, (N, C, H, W), jnp.float32)
    params = (make_encoder_params(k_base),
              make_encoder_params(k_mom),
              make_proj_params(k_proj))
    out = jax.jit(dama_forward)(imgs, params)
    jax.block_until_ready(out)
    print("KERNEL_OK")
</pallas_src>

<mosaic_0001>
module attributes {stable_mosaic.version = 11 : i64} {
  func.func @_recon_loss_kernel(%arg0: memref<32x128xf32, #tpu.memory_space<vmem>>, %arg1: memref<32x128xf32, #tpu.memory_space<vmem>>, %arg2: memref<32x1xf32, #tpu.memory_space<vmem>>, %arg3: memref<40x1xf32, #tpu.memory_space<vmem>>) attributes {dimension_semantics = [], scalar_prefetch = 0 : i64, scratch_operands = 0 : i64, tpu.core_type = #tpu.core_type<tc>} {
    %c0 = arith.constant 0 : index
    %c0_0 = arith.constant 0 : index
    %0 = vector.load %arg0[%c0, %c0_0] : memref<32x128xf32, #tpu.memory_space<vmem>>, vector<32x128xf32>
    %c0_1 = arith.constant 0 : index
    %c0_2 = arith.constant 0 : index
    %1 = vector.load %arg1[%c0_1, %c0_2] : memref<32x128xf32, #tpu.memory_space<vmem>>, vector<32x128xf32>
    %2 = arith.subf %0, %1 : vector<32x128xf32>
    %3 = arith.mulf %2, %2 : vector<32x128xf32>
    %cst = arith.constant dense<0.000000e+00> : vector<32xf32>
    %4 = vector.multi_reduction <add>, %3, %cst [1] : vector<32x128xf32> to vector<32xf32>
    %5 = vector.shape_cast %4 : vector<32xf32> to vector<32x1xf32>
    %cst_3 = arith.constant 0.00892857183 : f32
    %6 = vector.broadcast %cst_3 : f32 to vector<32x1xf32>
    %7 = arith.mulf %5, %6 : vector<32x1xf32>
    %c0_4 = arith.constant 0 : index
    %c0_5 = arith.constant 0 : index
    %8 = vector.load %arg2[%c0_4, %c0_5] : memref<32x1xf32, #tpu.memory_space<vmem>>, vector<32x1xf32>
    %9 = arith.mulf %7, %8 : vector<32x1xf32>
    %10 = vector.shape_cast %9 : vector<32x1xf32> to vector<1x32x1xf32>
    %cst_6 = arith.constant dense<0.000000e+00> : vector<1xf32>
    %11 = vector.multi_reduction <add>, %10, %cst_6 [1, 2] : vector<1x32x1xf32> to vector<1xf32>
    %12 = vector.shape_cast %11 : vector<1xf32> to vector<1x1x1xf32>
    %13 = vector.extract %12[0, 0, 0] : f32 from vector<1x1x1xf32>
    %14 = vector.broadcast %13 : f32 to vector<1x1xf32>
    %15 = vector.shape_cast %8 : vector<32x1xf32> to vector<1x32x1xf32>
    %cst_7 = arith.constant dense<0.000000e+00> : vector<1xf32>
    %16 = vector.multi_reduction <add>, %15, %cst_7 [1, 2] : vector<1x32x1xf32> to vector<1xf32>
    %17 = vector.shape_cast %16 : vector<1xf32> to vector<1x1x1xf32>
    %18 = vector.extract %17[0, 0, 0] : f32 from vector<1x1x1xf32>
    %19 = vector.broadcast %18 : f32 to vector<1x1xf32>
    %cst_8 = arith.constant 1.000000e+00 : f32
    %20 = vector.broadcast %cst_8 : f32 to vector<1x1xf32>
    %21 = arith.maximumf %19, %20 : vector<1x1xf32>
    %22 = tpu.reciprocal %21 : vector<1x1xf32> -> vector<1x1xf32>
    %23 = arith.mulf %14, %22 : vector<1x1xf32>
    %c0_9 = arith.constant 0 : index
    %c0_10 = arith.constant 0 : index
    %24 = vector.load %arg3[%c0_9, %c0_10] : memref<40x1xf32, #tpu.memory_space<vmem>>, vector<32x1xf32>
    tpu.vector_store %arg3[%c0_9, %c0_10], %7 {strides = array<i32>} : memref<40x1xf32, #tpu.memory_space<vmem>>, vector<32x1xf32>,
    %25 = vector.shape_cast %23 : vector<1x1xf32> to vector<1x1xf32>
    %26 = vector.broadcast %25 : vector<1x1xf32> to vector<8x1xf32>
    %c32 = arith.constant 32 : index
    %c0_11 = arith.constant 0 : index
    %27 = vector.load %arg3[%c32, %c0_11] : memref<40x1xf32, #tpu.memory_space<vmem>>, vector<8x1xf32>
    tpu.vector_store %arg3[%c32, %c0_11], %26 {strides = array<i32>} : memref<40x1xf32, #tpu.memory_space<vmem>>, vector<8x1xf32>,
    return
  }
}

module attributes {stable_mosaic.version = 11 : i64} {
  func.func @_teacher_fused_kernel(%arg0: memref<32x128xf32, #tpu.memory_space<vmem>>, %arg1: memref<32x128xf32, #tpu.memory_space<vmem>>, %arg2: memref<32x1xf32, #tpu.memory_space<vmem>>, %arg3: memref<16x32xf32, #tpu.memory_space<vmem>>, %arg4: memref<104x64xf32, #tpu.memory_space<vmem>>, %arg5: memref<96x32xf32, #tpu.memory_space<vmem>>, %arg6: memref<1x2xf32, #tpu.memory_space<vmem>>) attributes {dimension_semantics = [], scalar_prefetch = 0 : i64, scratch_operands = 0 : i64, tpu.core_type = #tpu.core_type<tc>} {
    %c0 = arith.constant 0 : index
    %c0_0 = arith.constant 0 : index
    %0 = vector.load %arg0[%c0, %c0_0] : memref<32x128xf32, #tpu.memory_space<vmem>>, vector<32x128xf32>
    %c0_1 = arith.constant 0 : index
    %c0_2 = arith.constant 0 : index
    %1 = vector.load %arg1[%c0_1, %c0_2] : memref<32x128xf32, #tpu.memory_space<vmem>>, vector<32x128xf32>
    %2 = arith.subf %0, %1 : vector<32x128xf32>
    %3 = arith.mulf %2, %2 : vector<32x128xf32>
    %cst = arith.constant dense<0.000000e+00> : vector<32xf32>
    %4 = vector.multi_reduction <add>, %3, %cst [1] : vector<32x128xf32> to vector<32xf32>
    %5 = vector.shape_cast %4 : vector<32xf32> to vector<32x1xf32>
    %cst_3 = arith.constant 0.00892857183 : f32
    %6 = vector.broadcast %cst_3 : f32 to vector<32x1xf32>
    %7 = arith.mulf %5, %6 : vector<32x1xf32>
    %c0_4 = arith.constant 0 : index
    %c0_5 = arith.constant 0 : index
    %8 = vector.load %arg2[%c0_4, %c0_5] : memref<32x1xf32, #tpu.memory_space<vmem>>, vector<32x1xf32>
    %9 = arith.mulf %7, %8 : vector<32x1xf32>
    %10 = vector.shape_cast %9 : vector<32x1xf32> to vector<1x32x1xf32>
    %cst_6 = arith.constant dense<0.000000e+00> : vector<1xf32>
    %11 = vector.multi_reduction <add>, %10, %cst_6 [1, 2] : vector<1x32x1xf32> to vector<1xf32>
    %12 = vector.shape_cast %11 : vector<1xf32> to vector<1x1x1xf32>
    %13 = vector.extract %12[0, 0, 0] : f32 from vector<1x1x1xf32>
    %14 = vector.broadcast %13 : f32 to vector<1x1xf32>
    %15 = vector.shape_cast %8 : vector<32x1xf32> to vector<1x32x1xf32>
    %cst_7 = arith.constant dense<0.000000e+00> : vector<1xf32>
    %16 = vector.multi_reduction <add>, %15, %cst_7 [1, 2] : vector<1x32x1xf32> to vector<1xf32>
    %17 = vector.shape_cast %16 : vector<1xf32> to vector<1x1x1xf32>
    %18 = vector.extract %17[0, 0, 0] : f32 from vector<1x1x1xf32>
    %19 = vector.broadcast %18 : f32 to vector<1x1xf32>
    %cst_8 = arith.constant 1.000000e+00 : f32
    %20 = vector.broadcast %cst_8 : f32 to vector<1x1xf32>
    %21 = arith.maximumf %19, %20 : vector<1x1xf32>
    %22 = tpu.reciprocal %21 : vector<1x1xf32> -> vector<1x1xf32>
    %23 = arith.mulf %14, %22 : vector<1x1xf32>
    %c0_9 = arith.constant 0 : index
    %c0_10 = arith.constant 0 : index
    %24 = vector.load %arg4[%c0_9, %c0_10] : memref<104x64xf32, #tpu.memory_space<vmem>>, vector<104x64xf32>
    %25 = vector.extract_strided_slice %24 {offsets = [0, 0], sizes = [32, 64], strides = [1, 1]} : vector<104x64xf32> to vector<32x64xf32>
    %26 = vector.extract_strided_slice %24 {offsets = [32, 0], sizes = [64, 32], strides = [1, 1]} : vector<104x64xf32> to vector<64x32xf32>
    %27 = vector.extract_strided_slice %24 {offsets = [96, 0], sizes = [1, 64], strides = [1, 1]} : vector<104x64xf32> to vector<1x64xf32>
    %28 = vector.extract_strided_slice %24 {offsets = [97, 0], sizes = [1, 64], strides = [1, 1]} : vector<104x64xf32> to vector<1x64xf32>
    %29 = vector.extract_strided_slice %24 {offsets = [98, 0], sizes = [1, 64], strides = [1, 1]} : vector<104x64xf32> to vector<1x64xf32>
    %30 = vector.extract_strided_slice %24 {offsets = [99, 0], sizes = [1, 32], strides = [1, 1]} : vector<104x64xf32> to vector<1x32xf32>
    %31 = vector.extract_strided_slice %24 {offsets = [100, 0], sizes = [1, 32], strides = [1, 1]} : vector<104x64xf32> to vector<1x32xf32>
    %32 = vector.extract_strided_slice %24 {offsets = [101, 0], sizes = [1, 32], strides = [1, 1]} : vector<104x64xf32> to vector<1x32xf32>
    %c0_11 = arith.constant 0 : index
    %c0_12 = arith.constant 0 : index
    %33 = vector.load %arg3[%c0_11, %c0_12] : memref<16x32xf32, #tpu.memory_space<vmem>>, vector<16x32xf32>
    %cst_13 = arith.constant dense<0.000000e+00> : vector<16x64xf32>
    %34 = tpu.matmul %33, %25, %cst_13 {dimension_numbers = #tpu.dot_dimension_numbers<[1], [0], [0], [1], [0, 0, 1, 1], [], []>} : vector<16x32xf32>, vector<32x64xf32>, vector<16x64xf32> -> vector<16x64xf32>
    %35 = vector.broadcast %27 : vector<1x64xf32> to vector<16x64xf32>
    %36 = arith.addf %34, %35 : vector<16x64xf32>
    %cst_14 = arith.constant dense<0.000000e+00> : vector<16xf32>
    %37 = vector.multi_reduction <add>, %36, %cst_14 [1] : vector<16x64xf32> to vector<16xf32>
    %38 = vector.shape_cast %37 : vector<16xf32> to vector<16x1xf32>
    %cst_15 = arith.constant 6.400000e+01 : f32
    %39 = vector.broadcast %cst_15 : f32 to vector<16x1xf32>
    %40 = arith.divf %38, %39 : vector<16x1xf32>
    %41 = vector.broadcast %40 : vector<16x1xf32> to vector<16x64xf32>
    %42 = arith.subf %36, %41 : vector<16x64xf32>
    %43 = arith.mulf %42, %42 : vector<16x64xf32>
    %cst_16 = arith.constant dense<0.000000e+00> : vector<16xf32>
    %44 = vector.multi_reduction <add>, %43, %cst_16 [1] : vector<16x64xf32> to vector<16xf32>
    %45 = vector.shape_cast %44 : vector<16xf32> to vector<16x1xf32>
    %cst_17 = arith.constant 6.400000e+01 : f32
    %46 = vector.broadcast %cst_17 : f32 to vector<16x1xf32>
    %47 = arith.divf %45, %46 : vector<16x1xf32>
    %48 = vector.broadcast %40 : vector<16x1xf32> to vector<16x64xf32>
    %49 = arith.subf %36, %48 : vector<16x64xf32>
    %cst_18 = arith.constant 9.99999974E-6 : f32
    %50 = vector.broadcast %cst_18 : f32 to vector<16x1xf32>
    %51 = arith.addf %47, %50 : vector<16x1xf32>
    %52 = math.rsqrt %51 : vector<16x1xf32>
    %53 = vector.broadcast %52 : vector<16x1xf32> to vector<16x64xf32>
    %54 = arith.mulf %49, %53 : vector<16x64xf32>
    %55 = vector.broadcast %28 : vector<1x64xf32> to vector<16x64xf32>
    %56 = arith.mulf %54, %55 : vector<16x64xf32>
    %57 = vector.broadcast %29 : vector<1x64xf32> to vector<16x64xf32>
    %58 = arith.addf %56, %57 : vector<16x64xf32>
    %cst_19 = arith.constant 0.000000e+00 : f32
    %59 = vector.broadcast %cst_19 : f32 to vector<16x64xf32>
    %60 = arith.maximumf %58, %59 : vector<16x64xf32>
    %cst_20 = arith.constant dense<0.000000e+00> : vector<16x32xf32>
    %61 = tpu.matmul %60, %26, %cst_20 {dimension_numbers = #tpu.dot_dimension_numbers<[1], [0], [0], [1], [0, 0, 1, 1], [], []>} : vector<16x64xf32>, vector<64x32xf32>, vector<16x32xf32> -> vector<16x32xf32>
    %62 = vector.broadcast %30 : vector<1x32xf32> to vector<16x32xf32>
    %63 = arith.addf %61, %62 : vector<16x32xf32>
    %cst_21 = arith.constant dense<0.000000e+00> : vector<16xf32>
    %64 = vector.multi_reduction <add>, %63, %cst_21 [1] : vector<16x32xf32> to vector<16xf32>
    %65 = vector.shape_cast %64 : vector<16xf32> to vector<16x1xf32>
    %cst_22 = arith.constant 3.200000e+01 : f32
    %66 = vector.broadcast %cst_22 : f32 to vector<16x1xf32>
    %67 = arith.divf %65, %66 : vector<16x1xf32>
    %68 = vector.broadcast %67 : vector<16x1xf32> to vector<16x32xf32>
    %69 = arith.subf %63, %68 : vector<16x32xf32>
    %70 = arith.mulf %69, %69 : vector<16x32xf32>
    %cst_23 = arith.constant dense<0.000000e+00> : vector<16xf32>
    %71 = vector.multi_reduction <add>, %70, %cst_23 [1] : vector<16x32xf32> to vector<16xf32>
    %72 = vector.shape_cast %71 : vector<16xf32> to vector<16x1xf32>
    %cst_24 = arith.constant 3.200000e+01 : f32
    %73 = vector.broadcast %cst_24 : f32 to vector<16x1xf32>
    %74 = arith.divf %72, %73 : vector<16x1xf32>
    %75 = vector.broadcast %67 : vector<16x1xf32> to vector<16x32xf32>
    %76 = arith.subf %63, %75 : vector<16x32xf32>
    %cst_25 = arith.constant 9.99999974E-6 : f32
    %77 = vector.broadcast %cst_25 : f32 to vector<16x1xf32>
    %78 = arith.addf %74, %77 : vector<16x1xf32>
    %79 = math.rsqrt %78 : vector<16x1xf32>
    %80 = vector.broadcast %79 : vector<16x1xf32> to vector<16x32xf32>
    %81 = arith.mulf %76, %80 : vector<16x32xf32>
    %82 = vector.broadcast %31 : vector<1x32xf32> to vector<16x32xf32>
    %83 = arith.mulf %81, %82 : vector<16x32xf32>
    %84 = vector.broadcast %32 : vector<1x32xf32> to vector<16x32xf32>
    %85 = arith.addf %83, %84 : vector<16x32xf32>
    %cst_26 = arith.constant 0.000000e+00 : f32
    %86 = vector.broadcast %cst_26 : f32 to vector<16x32xf32>
    %87 = arith.maximumf %85, %86 : vector<16x32xf32>
    %cst_27 = arith.constant dense<0xFF800000> : vector<16xf32>
    %88 = vector.multi_reduction <maximumf>, %87, %cst_27 [1] : vector<16x32xf32> to vector<16xf32>
    %89 = vector.shape_cast %88 : vector<16xf32> to vector<16x1xf32>
    %90 = vector.broadcast %89 : vector<16x1xf32> to vector<16x32xf32>
    %91 = arith.subf %87, %90 : vector<16x32xf32>
    %92 = math.exp %91 : vector<16x32xf32>
    %cst_28 = arith.constant dense<0.000000e+00> : vector<16xf32>
    %93 = vector.multi_reduction <add>, %92, %cst_28 [1] : vector<16x32xf32> to vector<16xf32>
    %94 = vector.shape_cast %93 : vector<16xf32> to vector<16x1xf32>
    %95 = tpu.reciprocal %94 {approx = true} : vector<16x1xf32> -> vector<16x1xf32>
    %96 = vector.broadcast %95 : vector<16x1xf32> to vector<16x32xf32>
    %97 = arith.mulf %92, %96 : vector<16x32xf32>
    %c0_29 = arith.constant 0 : index
    %c0_30 = arith.constant 0 : index
    %98 = vector.load %arg5[%c0_29, %c0_30] : memref<96x32xf32, #tpu.memory_space<vmem>>, vector<96x32xf32>
    %cst_31 = arith.constant dense<0.000000e+00> : vector<96xf32>
    %99 = vector.multi_reduction <add>, %98, %cst_31 [1] : vector<96x32xf32> to vector<96xf32>
    %100 = vector.shape_cast %99 : vector<96xf32> to vector<96x1xf32>
    %cst_32 = arith.constant 3.200000e+01 : f32
    %101 = vector.broadcast %cst_32 : f32 to vector<96x1xf32>
    %102 = arith.divf %100, %101 : vector<96x1xf32>
    %103 = vector.broadcast %102 : vector<96x1xf32> to vector<96x32xf32>
    %104 = arith.subf %98, %103 : vector<96x32xf32>
    %105 = arith.mulf %104, %104 : vector<96x32xf32>
    %cst_33 = arith.constant dense<0.000000e+00> : vector<96xf32>
    %106 = vector.multi_reduction <add>, %105, %cst_33 [1] : vector<96x32xf32> to vector<96xf32>
    %107 = vector.shape_cast %106 : vector<96xf32> to vector<96x1xf32>
    %cst_34 = arith.constant 3.200000e+01 : f32
    %108 = vector.broadcast %cst_34 : f32 to vector<96x1xf32>
    %109 = arith.divf %107, %108 : vector<96x1xf32>
    %110 = vector.broadcast %102 : vector<96x1xf32> to vector<96x32xf32>
    %111 = arith.subf %98, %110 : vector<96x32xf32>
    %cst_35 = arith.constant 9.99999974E-6 : f32
    %112 = vector.broadcast %cst_35 : f32 to vector<96x1xf32>
    %113 = arith.addf %109, %112 : vector<96x1xf32>
    %114 = math.rsqrt %113 : vector<96x1xf32>
    %115 = vector.broadcast %114 : vector<96x1xf32> to vector<96x32xf32>
    %116 = arith.mulf %111, %115 : vector<96x32xf32>
    %117 = vector.extract_strided_slice %116 {offsets = [0, 0], sizes = [16, 32], strides = [1, 1]} : vector<96x32xf32> to vector<16x32xf32>
    %118 = vector.extract_strided_slice %116 {offsets = [16, 0], sizes = [16, 32], strides = [1, 1]} : vector<96x32xf32> to vector<16x32xf32>
    %119 = arith.addf %117, %118 : vector<16x32xf32>
    %120 = vector.extract_strided_slice %116 {offsets = [32, 0], sizes = [16, 32], strides = [1, 1]} : vector<96x32xf32> to vector<16x32xf32>
    %121 = arith.addf %119, %120 : vector<16x32xf32>
    %122 = vector.extract_strided_slice %116 {offsets = [48, 0], sizes = [16, 32], strides = [1, 1]} : vector<96x32xf32> to vector<16x32xf32>
    %123 = arith.addf %121, %122 : vector<16x32xf32>
    %124 = vector.extract_strided_slice %116 {offsets = [64, 0], sizes = [16, 32], strides = [1, 1]} : vector<96x32xf32> to vector<16x32xf32>
    %125 = arith.addf %123, %124 : vector<16x32xf32>
    %126 = vector.extract_strided_slice %116 {offsets = [80, 0], sizes = [16, 32], strides = [1, 1]} : vector<96x32xf32> to vector<16x32xf32>
    %127 = arith.addf %125, %126 : vector<16x32xf32>
    %cst_36 = arith.constant 0.166666672 : f32
    %128 = vector.broadcast %cst_36 : f32 to vector<16x32xf32>
    %129 = arith.mulf %127, %128 : vector<16x32xf32>
    %cst_37 = arith.constant dense<0xFF800000> : vector<16xf32>
    %130 = vector.multi_reduction <maximumf>, %129, %cst_37 [1] : vector<16x32xf32> to vector<16xf32>
    %131 = vector.shape_cast %130 : vector<16xf32> to vector<16x1xf32>
    %132 = vector.broadcast %131 : vector<16x1xf32> to vector<16x32xf32>
    %133 = arith.subf %129, %132 : vector<16x32xf32>
    %134 = math.exp %133 : vector<16x32xf32>
    %cst_38 = arith.constant dense<0.000000e+00> : vector<16xf32>
    %135 = vector.multi_reduction <add>, %134, %cst_38 [1] : vector<16x32xf32> to vector<16xf32>
    %136 = vector.shape_cast %135 : vector<16xf32> to vector<16x1xf32>
    %137 = tpu.reciprocal %136 {approx = true} : vector<16x1xf32> -> vector<16x1xf32>
    %138 = vector.broadcast %137 : vector<16x1xf32> to vector<16x32xf32>
    %139 = arith.mulf %134, %138 : vector<16x32xf32>
    %140 = arith.subf %97, %139 : vector<16x32xf32>
    %141 = math.absf %140 : vector<16x32xf32>
    %cst_39 = arith.constant 2.000000e+00 : f32
    %142 = vector.broadcast %cst_39 : f32 to vector<16x32xf32>
    %143 = arith.cmpf olt, %141, %142 : vector<16x32xf32>
    %cst_40 = arith.constant 2.500000e-01 : f32
    %144 = vector.broadcast %cst_40 : f32 to vector<16x32xf32>
    %145 = arith.mulf %144, %140 : vector<16x32xf32>
    %146 = arith.mulf %145, %140 : vector<16x32xf32>
    %cst_41 = arith.constant 1.000000e+00 : f32
    %147 = vector.broadcast %cst_41 : f32 to vector<16x32xf32>
    %148 = arith.subf %141, %147 : vector<16x32xf32>
    %149 = arith.select %143, %146, %148 : vector<16x32xi1>, vector<16x32xf32>
    %150 = vector.shape_cast %149 : vector<16x32xf32> to vector<1x16x32xf32>
    %cst_42 = arith.constant dense<0.000000e+00> : vector<1xf32>
    %151 = vector.multi_reduction <add>, %150, %cst_42 [1, 2] : vector<1x16x32xf32> to vector<1xf32>
    %152 = vector.shape_cast %151 : vector<1xf32> to vector<1x1x1xf32>
    %153 = vector.extract %152[0, 0, 0] : f32 from vector<1x1x1xf32>
    %154 = vector.broadcast %153 : f32 to vector<1x1xf32>
    %cst_43 = arith.constant 1.000000e+00 : f32
    %155 = vector.broadcast %cst_43 : f32 to vector<1x1xf32>
    %156 = arith.mulf %154, %155 : vector<1x1xf32>
    %157 = tpu.iota {dimensions = array<i32: 1>} : vector<1x2xi32>
    %c0_i32 = arith.constant 0 : i32
    %158 = vector.broadcast %c0_i32 : i32 to vector<1x2xi32>
    %159 = arith.cmpi eq, %157, %158 : vector<1x2xi32>
    %160 = vector.shape_cast %23 : vector<1x1xf32> to vector<1x1xf32>
    %161 = vector.broadcast %160 : vector<1x1xf32> to vector<1x2xf32>
    %162 = vector.shape_cast %156 : vector<1x1xf32> to vector<1x1xf32>
    %163 = vector.broadcast %162 : vector<1x1xf32> to vector<1x2xf32>
    %164 = arith.select %159, %161, %163 : vector<1x2xi1>, vector<1x2xf32>
    %c0_44 = arith.constant 0 : index
    %c0_45 = arith.constant 0 : index
    %165 = vector.load %arg6[%c0_44, %c0_45] : memref<1x2xf32, #tpu.memory_space<vmem>>, vector<1x2xf32>
    tpu.vector_store %arg6[%c0_44, %c0_45], %164 {strides = array<i32>} : memref<1x2xf32, #tpu.memory_space<vmem>>, vector<1x2xf32>,
    return
  }
}

</mosaic_0001>

<bundles_post_ra>
// kernel: dama_forward.2
= control target key start
LH: loop header
LB: loop body
LE: loop exit
PB: predicated region body
PF: predicated region fallthrough
CT: control target
= control target key end

     0   :  { %vm50_vm0 = vcmask 7168   ;;  %s200_s0 = inlined_call_operand.vmem [shape: f32[32,128], index: 0, kind: input, shape index: {}]   ;;  %s201_s1 = inlined_call_operand.vmem [shape: f32[32,128], index: 1, kind: input, shape index: {}]   ;;  %s202_s3 = inlined_call_operand.vmem [shape: f32[40,1], index: 3, kind: output, shape index: {}]   ;;  %s203_s2 = inlined_call_operand.vmem [shape: f32[32,1], index: 2, kind: input, shape index: {}]  }
   0x1   :  { %v14_v0 = vld [vmem:[%s200_s0] sm:$0xff]  ;;  %v16_v2 = vld [vmem:[%s200_s0 + $0x10] sm:$0xff]  ;;  %v15_v6 = vld [vmem:[%s200_s0 + $0x8] sm:$0xff] }
   0x2   :  { %v18_v1 = vld [vmem:[%s201_s1] sm:$0xff]  ;;  %v20_v4 = vld [vmem:[%s201_s1 + $0x10] sm:$0xff]  ;;  %v19_v7 = vld [vmem:[%s201_s1 + $0x8] sm:$0xff] }
   0x3   :  { %v22_v3 = vsub.f32 %v14_v0, %v18_v1  ;;  %v24_v5 = vsub.f32 %v16_v2, %v20_v4  ;;  %v17_v9 = vld [vmem:[%s200_s0 + $0x18] sm:$0xff]  ;;  %v23_v12 = vsub.f32 %v15_v6, %v19_v7  ;;  %v42_v20 = vld [vmem:[%s203_s2] sm:$0xff]  ;;  %v44_v21 = vld [vmem:[%s203_s2 + $0x10] sm:$0xff] }
   0x4   :  { %v21_v10 = vld [vmem:[%s201_s1 + $0x18] sm:$0xff]  ;;  %v43_v22 = vld [vmem:[%s203_s2 + $0x8] sm:$0xff]  ;;  %v68_v32 = vsel %vm50_vm0, %v42_v20, 0.0  ;;  %v71_v41 = vsel %vm50_vm0, %v44_v21, 0.0 }
   0x5   :  { %v26_v8 = vmul.f32 %v22_v3, %v22_v3  ;;  %v28_v11 = vmul.f32 %v24_v5, %v24_v5  ;;  %v25_v13 = vsub.f32 %v17_v9, %v21_v10  ;;  %v27_v14 = vmul.f32 %v23_v12, %v23_v12  ;;  %v45_v26 = vld [vmem:[%s203_s2 + $0x18] sm:$0xff] }
   0x6   :  { %v69_v34 = vsel %vm50_vm0, %v43_v22, 0.0  ;;  %v73_v44 = vsel %vm50_vm0, %v45_v26, 0.0 }
   0x7   :  { %30 = vadd.xlane.f32.xlu0 %v26_v8  ;;  %34 = vadd.xlane.f32.xlu1 %v28_v11  ;;  %v29_v15 = vmul.f32 %v25_v13, %v25_v13  ;;  %v70_v39 = vadd.f32 %v69_v34, %v68_v32 }
   0x9   :  { %v72_v43 = vadd.f32 %v71_v41, %v70_v39 }
   0xb   :  { %v74_v45 = vadd.f32 %v73_v44, %v72_v43 }
   0xf   :  { %32 = vadd.xlane.f32.xlu0 %v27_v14  ;;  %36 = vadd.xlane.f32.xlu1 %v29_v15 }
  0x7a   :  { %v31_v16 = vpop.xlane.xlu0 %30  ;;  %v35_v18 = vpop.xlane.xlu1 %34 }
  0x7b   :  { %v38_v17 = vmul.f32 0.008928572, %v31_v16  ;;  %v40_v19 = vmul.f32 0.008928572, %v35_v18 }
  0x7d   :  { %101 = vst.msk [vmem:[%s202_s3] sm:$0xff] %vm50_vm0, %v38_v17  ;;  %v46_v24 = vmul.f32 %v42_v20, %v38_v17  ;;  %v48_v29 = vmul.f32 %v44_v21, %v40_v19 }
  0x7e   :  { %103 = vst.msk [vmem:[%s202_s3 + $0x10] sm:$0xff] %vm50_vm0, %v40_v19 }
  0x7f   :  { %v51_v33 = vsel %vm50_vm0, %v46_v24, 0.0  ;;  %v54_v37 = vsel %vm50_vm0, %v48_v29, 0.0 }
  0x82   :  { %v33_v23 = vpop.xlane.xlu0 %32  ;;  %v37_v27 = vpop.xlane.xlu1 %36 }
  0x83   :  { %v39_v25 = vmul.f32 0.008928572, %v33_v23  ;;  %v41_v28 = vmul.f32 0.008928572, %v37_v27 }
  0x85   :  { %v47_v30 = vmul.f32 %v43_v22, %v39_v25  ;;  %102 = vst.msk [vmem:[%s202_s3 + $0x8] sm:$0xff] %vm50_vm0, %v39_v25  ;;  %v49_v31 = vmul.f32 %v45_v26, %v41_v28 }
  0x86   :  { %104 = vst.msk [vmem:[%s202_s3 + $0x18] sm:$0xff] %vm50_vm0, %v41_v28 }
  0x87   :  { %v52_v35 = vsel %vm50_vm0, %v47_v30, 0.0  ;;  %v56_v38 = vsel %vm50_vm0, %v49_v31, 0.0 }
  0x88   :  { %v53_v36 = vadd.f32 %v52_v35, %v51_v33 }
  0x8a   :  { %v55_v40 = vadd.f32 %v54_v37, %v53_v36 }
  0x8c   :  { %v57_v42 = vadd.f32 %v56_v38, %v55_v40 }
  0x8e   :  { %58 = vadd.xlane.f32.xlu2 %v57_v42 }
  0x96   :  { %75 = vadd.xlane.f32.xlu2 %v74_v45 }
 0x101   :  { %v59_v46 = vpop.xlane.xlu2 %58 }
 0x102   :  { %v60_v47 = vrot.slane %v59_v46, 4 }
 0x104   :  { %v61_v48 = vadd.f32 %v60_v47, %v59_v46 }
 0x106   :  { %v62_v49 = vrot.slane %v61_v48, 2 }
 0x108   :  { %v63_v50 = vadd.f32 %v62_v49, %v61_v48 }
 0x109   :  { %v76_v51 = vpop.xlane.xlu2 %75 }
 0x10a   :  { %v77_v52 = vrot.slane %v76_v51, 4  ;;  %v64_v53 = vrot.slane %v63_v50, 1 }
 0x10c   :  { %v78_v54 = vadd.f32 %v77_v52, %v76_v51  ;;  %v65_v55 = vadd.f32 %v64_v53, %v63_v50 }
 0x10e   :  { %v79_v56 = vrot.slane %v78_v54, 2  ;;  %110 = vpush %v65_v55 }
 0x110   :  { %v80_v57 = vadd.f32 %v79_v56, %v78_v54 }
 0x112   :  { %v81_v58 = vrot.slane %v80_v57, 1 }
 0x114   :  { %v82_v59 = vadd.f32 %v81_v58, %v80_v57 }
 0x116   :  { %112 = vpush %v82_v59 }
 0x13f   :  { %s111_s2 = spop %110 }
 0x140   :  { %v67_v7 = vstv %s111_s2 }
 0x147   :  { %s113_s15 = spop %112 }
 0x148   :  { %v84_v60 = vstv %s113_s15 }
 0x149   :  { %v85_v61 = vmax.f32 %v84_v60, 1.0 }
 0x14b   :  { %114 = vrcp.f32 %v85_v61  ;;  %v97_v1 = vand.u32 2147483648, %v85_v61  ;;  %v95_v3 = vand.u32 2147483647, %v85_v61  ;;  %vm91_vm2 = vweird.f32 %v85_v61 }
 0x14d   :  { %v98_v5 = vor.u32 1.1754944e-38, %v97_v1  ;;  %vm96_vm4 = vcmp.eq.f32.partialorder %v95_v3, 8.507059e+37 }
 0x151   :  { %v115_v62 = vpop.eup %114 }
 0x152   :  { %v87_v63 = vmul.f32 %v115_v62, %v85_v61  ;;  %vm92_vm1 = vweird.f32 %v115_v62 }
 0x153   :  { %vm93_vm3 = vmor %vm91_vm2, %vm92_vm1 }
 0x154   :  { %v88_v0 = vsub.f32 1.0, %v87_v63 }
 0x156   :  { %v89_v2 = vmul.f32 %v115_v62, %v88_v0 }
 0x158   :  { %v90_v4 = vadd.f32 %v115_v62, %v89_v2 }
 0x15a   :  { %v94_v6 = vsel %vm93_vm3, %v115_v62, %v90_v4 }
 0x15b   :  { %v99_v8 = vsel %vm96_vm4, %v98_v5, %v94_v6 }
 0x15c   :  { %v100_v9 = vmul.f32 %v99_v8, %v67_v7 }
 0x15e   :  { %105 = vst.msk [vmem:[%s202_s3 + $0x20] sm:$0xff] %vm50_vm0, %v100_v9 }

// kernel: dama_forward.3
= control target key start
LH: loop header
LB: loop body
LE: loop exit
PB: predicated region body
PF: predicated region fallthrough
CT: control target
= control target key end

     0   :  { %vm126_vm0 = vcmask 261120   ;;  %vm156_vm1 = vcmask 523264   ;;  %v754_v14 = vmov 64.0   ;;  %s1360_s4 = inlined_call_operand.vmem [shape: f32[104,64], index: 4, kind: input, shape index: {}]   ;;  %s1361_s3 = inlined_call_operand.vmem [shape: f32[16,32], index: 3, kind: input, shape index: {}]   ;;  %s1362_s5 = inlined_call_operand.vmem [shape: f32[96,32], index: 5, kind: input, shape index: {}]   ;;  %s1363_s0 = inlined_call_operand.vmem [shape: f32[32,128], index: 0, kind: input, shape index: {}]   ;;  %s1364_s1 = inlined_call_operand.vmem [shape: f32[32,128], index: 1, kind: input, shape index: {}]   ;;  %s1365_s2 = inlined_call_operand.vmem [shape: f32[32,1], index: 2, kind: input, shape index: {}]   ;;  %s1366_s6 = inlined_call_operand.vmem [shape: f32[1,2], index: 6, kind: output, shape index: {}]  }
   0x1   :  { %v113_v0 = vld [vmem:[%s1360_s4 + $0x18] sm:$0xff]  ;;  %v112_v1 = vld [vmem:[%s1360_s4 + $0x10] sm:$0xff]  ;;  %v111_v2 = vld [vmem:[%s1360_s4 + $0x8] sm:$0xff]  ;;  %700 = vrcp.f32 %v754_v14 }
   0x2   :  { %680 = vmatpush.msra.mxu3 %v113_v0  ;;  %145 = vmatpush.msra.mxu0 %v113_v0  ;;  %v110_v3 = vld [vmem:[%s1360_s4] sm:$0xff]  ;;  %v124_v4 = vld [vmem:[%s1361_s3 + $0x8] sm:$0xff]  ;;  %v832_v31 = vld [vmem:[%s1362_s5 + $0x10] sm:$0xff] }
   0x3   :  { %v123_v5 = vld [vmem:[%s1361_s3] sm:$0xff]  ;;  %v345_v32 = vsel %vm126_vm0, %v832_v31, 0.0  ;;  %v121_v33 = vld [vmem:[%s1360_s4 + $0x58] sm:$0xff]  ;;  %v120_v34 = vld [vmem:[%s1360_s4 + $0x50] sm:$0xff] }
   0x4   :  { %681 = vmatpush.msra.mxu3 %v112_v1  ;;  %146 = vmatpush.msra.mxu0 %v112_v1  ;;  %v814_v6 = vld [vmem:[%s1360_s4 + $0x60] sm:$0xff]  ;;  %v845_v35 = vld [vmem:[%s1362_s5 + $0x28] sm:$0xff]  ;;  %v117_v39 = vld [vmem:[%s1360_s4 + $0x38] sm:$0xff] }
   0x5   :  { %v125_v7 = vperm.slane %v814_v6, 0  ;;  %684 = vmatpush.msra.mxu2 %v121_v33  ;;  %231 = vmatpush.msra.mxu1 %v121_v33  ;;  %v354_v36 = vsel %vm126_vm0, %v845_v35, 0.0  ;;  %v119_v37 = vld [vmem:[%s1360_s4 + $0x48] sm:$0xff]  ;;  %v118_v38 = vld [vmem:[%s1360_s4 + $0x40] sm:$0xff]  ;;  %v116_v40 = vld [vmem:[%s1360_s4 + $0x30] sm:$0xff] }
   0x6   :  { %682 = vmatpush.msra.mxu3 %v111_v2  ;;  %147 = vmatpush.msra.mxu0 %v111_v2  ;;  %v115_v41 = vld [vmem:[%s1360_s4 + $0x28] sm:$0xff]  ;;  %v114_v42 = vld [vmem:[%s1360_s4 + $0x20] sm:$0xff]  ;;  %v877_v49 = vld [vmem:[%s1362_s5 + $0x18] sm:$0xff]  ;;  %v208_v2 = vperm.slane %v814_v6, 1 }
   0x7   :  { %v701_v15 = vpop.eup %700  ;;  %685 = vmatpush.msra.mxu2 %v120_v34  ;;  %232 = vmatpush.msra.mxu1 %v120_v34  ;;  %v870_v46 = vld [vmem:[%s1362_s5] sm:$0xff]  ;;  %v348_v51 = vsel %vm126_vm0, %v877_v49, 0.0  ;;  %v884_v54 = vld [vmem:[%s1362_s5 + $0x8] sm:$0xff]  ;;  %v889_v56 = vld [vmem:[%s1362_s5 + $0x30] sm:$0xff] }
   0x8   :  { %683 = vmatpush.msra.mxu3 %v110_v3  ;;  %148 = vmatpush.msra.mxu0 %v110_v3  ;;  %v164_v16 = vmul.f32 64.0, %v701_v15  ;;  %vm168_vm2 = vweird.f32 %v701_v15  ;;  %v339_v48 = vsel %vm126_vm0, %v870_v46, 0.0  ;;  %v342_v58 = vsel %vm126_vm0, %v884_v54, 0.0  ;;  %v898_v63 = vld [vmem:[%s1362_s5 + $0x20] sm:$0xff] }
   0x9   :  { %675 = vmatmul.msk.f32.vlgmr.msra.gmra.mxu3 %vm126_vm0, %v124_v4  ;;  %674 = vmatmul.msk.f32.vlgmr.msra.gmra.mxu0 %vm126_vm0, %v123_v5  ;;  %v357_v59 = vsel %vm126_vm0, %v889_v56, 0.0  ;;  %v351_v5 = vsel %vm126_vm0, %v898_v63, 0.0 }
   0xa   :  { %v165_v17 = vsub.f32 1.0, %v164_v16  ;;  %686 = vmatpush.msra.mxu2 %v119_v37  ;;  %233 = vmatpush.msra.mxu1 %v119_v37 }
   0xb   :  { %340 = vadd.xlane.f32.xlu2 %v339_v48 }
   0xc   :  { %v166_v18 = vmul.f32 %v701_v15, %v165_v17  ;;  %687 = vmatpush.msra.mxu2 %v118_v38  ;;  %234 = vmatpush.msra.mxu1 %v118_v38 }
   0xe   :  { %v167_v19 = vadd.f32 %v701_v15, %v166_v18  ;;  %688 = vmatpush.msra.mxu2 %v117_v39  ;;  %235 = vmatpush.msra.mxu1 %v117_v39 }
  0x10   :  { %v169_v20 = vsel %vm168_vm2, %v701_v15, %v167_v19  ;;  %689 = vmatpush.msra.mxu2 %v116_v40  ;;  %236 = vmatpush.msra.mxu1 %v116_v40 }
  0x12   :  { %690 = vmatpush.msra.mxu2 %v115_v41  ;;  %237 = vmatpush.msra.mxu1 %v115_v41 }
  0x13   :  { %343 = vadd.xlane.f32.xlu2 %v342_v58  ;;  %v952_v58 = vld [vmem:[%s1362_s5 + $0x50] sm:$0xff] }
  0x14   :  { %691 = vmatpush.msra.mxu2 %v114_v42  ;;  %238 = vmatpush.msra.mxu1 %v114_v42 }
  0x1b   :  { %352 = vadd.xlane.f32.xlu2 %v351_v5 }
  0x86   :  { %v150_v10 = vpop.f32.mrf.mxu0 }
  0x87   :  { %v151_v12 = vadd.f32 %v150_v10, %v125_v7 }
  0x89   :  { %v157_v13 = vsel %vm156_vm1, %v151_v12, 0.0 }
  0x8c   :  { %v153_v8 = vpop.f32.mrf.mxu3 }
  0x8d   :  { %v154_v9 = vadd.f32 %v153_v8, %v125_v7  ;;  %v211_v8 = vperm.slane %v814_v6, 2 }
  0x8f   :  { %v160_v11 = vsel %vm156_vm1, %v154_v9, 0.0 }
  0x90   :  { %161 = vadd.xlane.f32.xlu0 %v160_v11 }
  0x98   :  { %158 = vadd.xlane.f32.xlu0 %v157_v13  ;;  %v908_v13 = vld [vmem:[%s1362_s5 + $0x38] sm:$0xff] }
  0x99   :  { %v360_v17 = vsel %vm126_vm0, %v908_v13, 0.0 }
  0x9a   :  { %361 = vadd.xlane.f32.xlu2 %v360_v17 }
  0xa0   :  { %346 = vadd.xlane.f32.xlu0 %v345_v32 }
  0xa8   :  { %355 = vadd.xlane.f32.xlu0 %v354_v36 }
 0x103   :  { %v162_v21 = vpop.xlane.xlu0 %161 }
 0x104   :  { %v171_v22 = vmul.f32 %v169_v20, %v162_v21  ;;  %v917_v21 = vld [vmem:[%s1362_s5 + $0x40] sm:$0xff] }
 0x106   :  { %v819_v23 = vsub.f32 %v154_v9, %v171_v22 }
 0x108   :  { %v175_v24 = vmul.f32 %v819_v23, %v819_v23 }
 0x10a   :  { %v179_v25 = vsel %vm156_vm1, %v175_v24, 0.0  ;;  %v925_v24 = vld [vmem:[%s1362_s5 + $0x58] sm:$0xff] }
 0x10b   :  { %180 = vadd.xlane.f32.xlu1 %v179_v25  ;;  %v159_v26 = vpop.xlane.xlu0 %158  ;;  %v372_v25 = vsel %vm126_vm0, %v925_v24, 0.0 }
 0x10c   :  { %v170_v27 = vmul.f32 %v169_v20, %v159_v26  ;;  %v755_v26 = vmov 32.0  }
 0x10e   :  { %v824_v28 = vsub.f32 %v151_v12, %v170_v27 }
 0x110   :  { %v174_v29 = vmul.f32 %v824_v28, %v824_v28 }
 0x112   :  { %v176_v30 = vsel %vm156_vm1, %v174_v29, 0.0 }
 0x113   :  { %177 = vadd.xlane.f32.xlu1 %v176_v30  ;;  %v347_v34 = vpop.xlane.xlu0 %346 }
 0x11b   :  { %349 = vadd.xlane.f32.xlu1 %v348_v51  ;;  %v356_v40 = vpop.xlane.xlu0 %355 }
 0x123   :  { %358 = vadd.xlane.f32.xlu1 %v357_v59 }
 0x17e   :  { %v181_v43 = vpop.xlane.xlu1 %180 }
 0x17f   :  { %v183_v44 = vmul.f32 %v181_v43, %v169_v20 }
 0x181   :  { %v185_v45 = vadd.f32 1e-05, %v183_v44 }
 0x183   :  { %702 = vrsqrt.f32 %v185_v45  ;;  %vm202_vm4 = vweird.f32 %v185_v45 }
 0x186   :  { %v178_v47 = vpop.xlane.xlu1 %177 }
 0x187   :  { %v182_v50 = vmul.f32 %v178_v47, %v169_v20  ;;  %v216_v47 = vperm.slane %v814_v6, 3 }
 0x189   :  { %v703_v52 = vpop.eup %702  ;;  %v184_v53 = vadd.f32 1e-05, %v182_v50 }
 0x18a   :  { %v197_v55 = vmul.f32 %v703_v52, %v185_v45  ;;  %vm203_vm3 = vweird.f32 %v703_v52 }
 0x18b   :  { %704 = vrsqrt.f32 %v184_v53  ;;  %vm204_vm5 = vmor %vm202_vm4, %vm203_vm3  ;;  %vm192_vm7 = vweird.f32 %v184_v53 }
 0x18c   :  { %v198_v57 = vmul.f32 %v703_v52, %v197_v55  ;;  %706 = vrcp.f32 %v755_v26 }
 0x18e   :  { %v199_v60 = vmul.f32 0.5, %v198_v57 }
 0x190   :  { %v200_v61 = vsub.f32 1.5, %v199_v60  ;;  %v958_v60 = vld [vmem:[%s1362_s5 + $0x48] sm:$0xff] }
 0x191   :  { %v705_v62 = vpop.eup %704 }
 0x192   :  { %v201_v0 = vmul.f32 %v703_v52, %v200_v61  ;;  %v187_v1 = vmul.f32 %v705_v62, %v184_v53  ;;  %vm193_vm6 = vweird.f32 %v705_v62  ;;  %v707_v27 = vpop.eup %706 }
 0x193   :  { %vm194_vm8 = vmor %vm192_vm7, %vm193_vm6  ;;  %vm257_vm9 = vweird.f32 %v707_v27 }
 0x194   :  { %v205_v3 = vsel %vm204_vm5, %v703_v52, %v201_v0  ;;  %v188_v4 = vmul.f32 %v705_v62, %v187_v1  ;;  %v350_v0 = vpop.xlane.xlu1 %349 }
 0x195   :  { %v207_v7 = vmul.f32 %v205_v3, %v819_v23  ;;  %v363_v23 = vsel %vm126_vm0, %v917_v21, 0.0 }
 0x196   :  { %v189_v9 = vmul.f32 0.5, %v188_v4  ;;  %364 = vadd.xlane.f32.xlu2 %v363_v23 }
 0x197   :  { %v210_v10 = vmul.f32 %v208_v2, %v207_v7 }
 0x198   :  { %v190_v11 = vsub.f32 1.5, %v189_v9 }
 0x199   :  { %v213_v12 = vadd.f32 %v211_v8, %v210_v10 }
 0x19a   :  { %v191_v14 = vmul.f32 %v705_v62, %v190_v11 }
 0x19b   :  { %v215_v15 = vmax.f32 %v213_v12, 0.0 }
 0x19c   :  { %v195_v16 = vsel %vm194_vm8, %v705_v62, %v191_v14  ;;  %v369_v62 = vsel %vm126_vm0, %v952_v58, 0.0  ;;  %v359_v11 = vpop.xlane.xlu1 %358 }
 0x19d   :  { %677 = vmatmul.msk.f32.vlgmr.msra.gmra.mxu2 %vm156_vm1, %v215_v15  ;;  %v206_v18 = vmul.f32 %v195_v16, %v824_v28  ;;  %v253_v28 = vmul.f32 32.0, %v707_v27 }
 0x19e   :  { %373 = vadd.xlane.f32.xlu2 %v372_v25 }
 0x19f   :  { %v209_v19 = vmul.f32 %v208_v2, %v206_v18  ;;  %v254_v29 = vsub.f32 1.0, %v253_v28  ;;  %v366_v2 = vsel %vm126_vm0, %v958_v60, 0.0 }
 0x1a1   :  { %v212_v20 = vadd.f32 %v211_v8, %v209_v19  ;;  %v255_v30 = vmul.f32 %v707_v27, %v254_v29 }
 0x1a3   :  { %v214_v22 = vmax.f32 %v212_v20, 0.0  ;;  %v256_v32 = vadd.f32 %v707_v27, %v255_v30 }
 0x1a5   :  { %676 = vmatmul.msk.f32.vlgmr.msra.gmra.mxu1 %vm156_vm1, %v214_v22  ;;  %v929_v33 = vsel %vm257_vm9, %v707_v27, %v256_v32 }
 0x1a6   :  { %v377_v36 = vmul.f32 %v347_v34, %v929_v33  ;;  %v380_v41 = vmul.f32 %v356_v40, %v929_v33  ;;  %v378_v7 = vmul.f32 %v350_v0, %v929_v33 }
 0x1a8   :  { %v933_v37 = vsub.f32 %v832_v31, %v377_v36  ;;  %v940_v42 = vsub.f32 %v845_v35, %v380_v41  ;;  %v341_v31 = vpop.xlane.xlu2 %340  ;;  %v982_v10 = vsub.f32 %v877_v49, %v378_v7 }
 0x1a9   :  { %v375_v59 = vmul.f32 %v341_v31, %v929_v33 }
 0x1aa   :  { %v401_v38 = vmul.f32 %v933_v37, %v933_v37  ;;  %v404_v43 = vmul.f32 %v940_v42, %v940_v42  ;;  %v402_v15 = vmul.f32 %v982_v10, %v982_v10 }
 0x1ab   :  { %v966_v1 = vsub.f32 %v870_v46, %v375_v59 }
 0x1ac   :  { %v417_v39 = vsel %vm126_vm0, %v401_v38, 0.0  ;;  %v426_v44 = vsel %vm126_vm0, %v404_v43, 0.0  ;;  %v420_v18 = vsel %vm126_vm0, %v402_v15, 0.0 }
 0x1ad   :  { %418 = vadd.xlane.f32.xlu2 %v417_v39 }
 0x1b0   :  { %v344_v45 = vpop.xlane.xlu2 %343 }
 0x1b1   :  { %v376_v57 = vmul.f32 %v344_v45, %v929_v33 }
 0x1b3   :  { %v961_v61 = vsub.f32 %v884_v54, %v376_v57  ;;  %v399_v54 = vmul.f32 %v966_v1, %v966_v1 }
 0x1b5   :  { %427 = vadd.xlane.f32.xlu2 %v426_v44  ;;  %v400_v4 = vmul.f32 %v961_v61, %v961_v61  ;;  %v411_v9 = vsel %vm126_vm0, %v399_v54, 0.0 }
 0x1b7   :  { %v414_v46 = vsel %vm126_vm0, %v400_v4, 0.0 }
 0x1b8   :  { %v353_v55 = vpop.xlane.xlu2 %352 }
 0x1b9   :  { %v379_v3 = vmul.f32 %v353_v55, %v929_v33 }
 0x1bb   :  { %v977_v8 = vsub.f32 %v898_v63, %v379_v3  ;;  %v381_v63 = vmul.f32 %v359_v11, %v929_v33 }
 0x1bd   :  { %v403_v14 = vmul.f32 %v977_v8, %v977_v8  ;;  %v996_v19 = vsub.f32 %v889_v56, %v381_v63 }
 0x1bf   :  { %v423_v49 = vsel %vm126_vm0, %v403_v14, 0.0  ;;  %v405_v23 = vmul.f32 %v996_v19, %v996_v19 }
 0x1c0   :  { %v362_v5 = vpop.xlane.xlu2 %361 }
 0x1c1   :  { %v382_v12 = vmul.f32 %v362_v5, %v929_v33  ;;  %v429_v27 = vsel %vm126_vm0, %v405_v23, 0.0 }
 0x1c3   :  { %v991_v17 = vsub.f32 %v908_v13, %v382_v12 }
 0x1c5   :  { %v406_v22 = vmul.f32 %v991_v17, %v991_v17 }
 0x1c7   :  { %v432_v25 = vsel %vm126_vm0, %v406_v22, 0.0 }
 0x209   :  { %v365_v16 = vpop.xlane.xlu2 %364 }
 0x20a   :  { %v383_v20 = vmul.f32 %v365_v16, %v929_v33 }
 0x20c   :  { %v1004_v13 = vsub.f32 %v917_v21, %v383_v20 }
 0x20e   :  { %v407_v28 = vmul.f32 %v1004_v13, %v1004_v13 }
 0x210   :  { %v435_v30 = vsel %vm126_vm0, %v407_v28, 0.0 }
 0x211   :  { %v374_v26 = vpop.xlane.xlu2 %373 }
 0x212   :  { %v386_v56 = vmul.f32 %v374_v26, %v929_v33 }
 0x214   :  { %v1012_v29 = vsub.f32 %v925_v24, %v386_v56 }
 0x216   :  { %v410_v21 = vmul.f32 %v1012_v29, %v1012_v29 }
 0x218   :  { %v444_v32 = vsel %vm126_vm0, %v410_v21, 0.0 }
 0x220   :  { %v243_v48 = vpop.f32.mrf.mxu2 }
 0x221   :  { %v244_v50 = vadd.f32 %v243_v48, %v216_v47 }
 0x222   :  { %v240_v51 = vpop.f32.mrf.mxu1 }
 0x223   :  { %v241_v52 = vadd.f32 %v240_v51, %v216_v47  ;;  %v249_v53 = vsel %vm126_vm0, %v244_v50, 0.0 }
 0x224   :  { %250 = vadd.xlane.f32.xlu1 %v249_v53 }
 0x225   :  { %v246_v35 = vsel %vm126_vm0, %v241_v52, 0.0 }
 0x226   :  { %247 = vadd.xlane.f32.xlu0 %v246_v35 }
 0x22c   :  { %370 = vadd.xlane.f32.xlu1 %v369_v62 }
 0x22e   :  { %367 = vadd.xlane.f32.xlu0 %v366_v2 }
 0x234   :  { %415 = vadd.xlane.f32.xlu1 %v414_v46 }
 0x236   :  { %412 = vadd.xlane.f32.xlu0 %v411_v9 }
 0x23c   :  { %424 = vadd.xlane.f32.xlu1 %v423_v49 }
 0x23e   :  { %421 = vadd.xlane.f32.xlu0 %v420_v18 }
 0x244   :  { %433 = vadd.xlane.f32.xlu1 %v432_v25 }
 0x246   :  { %430 = vadd.xlane.f32.xlu0 %v429_v27 }
 0x24c   :  { %436 = vadd.xlane.f32.xlu1 %v435_v30 }
 0x254   :  { %445 = vadd.xlane.f32.xlu1 %v444_v32 }
 0x297   :  { %v251_v34 = vpop.xlane.xlu1 %250 }
 0x298   :  { %v260_v36 = vmul.f32 %v929_v33, %v251_v34 }
 0x299   :  { %v248_v38 = vpop.xlane.xlu0 %247 }
 0x29a   :  { %v1019_v39 = vsub.f32 %v244_v50, %v260_v36  ;;  %v259_v40 = vmul.f32 %v929_v33, %v248_v38 }
 0x29c   :  { %v1022_v41 = vsub.f32 %v241_v52, %v259_v40  ;;  %v264_v24 = vmul.f32 %v1019_v39, %v1019_v39 }
 0x29e   :  { %v268_v43 = vsel %vm126_vm0, %v264_v24, 0.0  ;;  %v263_v44 = vmul.f32 %v1022_v41, %v1022_v41 }
 0x29f   :  { %269 = vadd.xlane.f32.xlu0 %v268_v43  ;;  %v371_v31 = vpop.xlane.xlu1 %370 }
 0x2a0   :  { %v385_v45 = vmul.f32 %v371_v31, %v929_v33  ;;  %v265_v47 = vsel %vm126_vm0, %v263_v44, 0.0 }
 0x2a1   :  { %266 = vadd.xlane.f32.xlu2 %v265_v47  ;;  %v368_v48 = vpop.xlane.xlu0 %367 }
 0x2a2   :  { %v1032_v50 = vsub.f32 %v952_v58, %v385_v45  ;;  %v384_v51 = vmul.f32 %v368_v48, %v929_v33  ;;  %v419_v58 = vpop.xlane.xlu2 %418 }
 0x2a3   :  { %v449_v2 = vmul.f32 %v419_v58, %v929_v33 }
 0x2a4   :  { %v1036_v52 = vsub.f32 %v958_v60, %v384_v51  ;;  %v409_v53 = vmul.f32 %v1032_v50, %v1032_v50 }
 0x2a5   :  { %v461_v3 = vadd.f32 1e-05, %v449_v2 }
 0x2a6   :  { %v441_v55 = vsel %vm126_vm0, %v409_v53, 0.0  ;;  %v408_v35 = vmul.f32 %v1036_v52, %v1036_v52 }
 0x2a7   :  { %442 = vadd.xlane.f32.xlu0 %v441_v55  ;;  %v416_v59 = vpop.xlane.xlu1 %415  ;;  %708 = vrsqrt.f32 %v461_v3  ;;  %vm497_vm10 = vweird.f32 %v461_v3 }
 0x2a8   :  { %v438_v57 = vsel %vm126_vm0, %v408_v35, 0.0  ;;  %v448_v54 = vmul.f32 %v416_v59, %v929_v33 }
 0x2a9   :  { %439 = vadd.xlane.f32.xlu2 %v438_v57  ;;  %v413_v62 = vpop.xlane.xlu0 %412 }
 0x2aa   :  { %v428_v60 = vpop.xlane.xlu2 %427  ;;  %v447_v46 = vmul.f32 %v413_v62, %v929_v33  ;;  %v1053_v14 = vadd.f32 1e-05, %v448_v54 }
 0x2ab   :  { %v452_v4 = vmul.f32 %v428_v60, %v929_v33 }
 0x2ac   :  { %v1055_v15 = vadd.f32 1e-05, %v447_v46  ;;  %vm487_vm15 = vweird.f32 %v1053_v14 }
 0x2ad   :  { %v1046_v5 = vadd.f32 1e-05, %v452_v4  ;;  %v1057_v63 = vpop.eup %708 }
 0x2ae   :  { %v492_v18 = vmul.f32 %v1057_v63, %v461_v3  ;;  %vm498_vm11 = vweird.f32 %v1057_v63  ;;  %vm477_vm2 = vweird.f32 %v1055_v15 }
 0x2af   :  { %v425_v0 = vpop.xlane.xlu1 %424  ;;  %710 = vrsqrt.f32 %v1046_v5  ;;  %vm1109_vm12 = vmor %vm497_vm10, %vm498_vm11  ;;  %vm527_vm13 = vweird.f32 %v1046_v5 }
 0x2b0   :  { %v451_v11 = vmul.f32 %v425_v0, %v929_v33  ;;  %712 = vrsqrt.f32 %v1053_v14  ;;  %v493_v25 = vmul.f32 %v1057_v63, %v492_v18 }
 0x2b1   :  { %v422_v7 = vpop.xlane.xlu0 %421  ;;  %714 = vrsqrt.f32 %v1055_v15 }
 0x2b2   :  { %v450_v12 = vmul.f32 %v422_v7, %v929_v33  ;;  %v1059_v16 = vadd.f32 1e-05, %v451_v11  ;;  %v494_v36 = vmul.f32 0.5, %v493_v25 }
 0x2b4   :  { %v1061_v49 = vadd.f32 1e-05, %v450_v12  ;;  %716 = vrsqrt.f32 %v1059_v16  ;;  %v495_v48 = vsub.f32 1.5, %v494_v36  ;;  %vm517_vm3 = vweird.f32 %v1059_v16 }
 0x2b5   :  { %v1066_v20 = vpop.eup %710 }
 0x2b6   :  { %718 = vrsqrt.f32 %v1061_v49  ;;  %v522_v26 = vmul.f32 %v1066_v20, %v1046_v5  ;;  %v1074_v56 = vpop.eup %712  ;;  %v496_v62 = vmul.f32 %v1057_v63, %v495_v48  ;;  %vm528_vm14 = vweird.f32 %v1066_v20 }
 0x2b7   :  { %v434_v9 = vpop.xlane.xlu1 %433  ;;  %v1077_v30 = vpop.eup %714  ;;  %v482_v44 = vmul.f32 %v1074_v56, %v1053_v14  ;;  %vm488_vm1 = vweird.f32 %v1074_v56  ;;  %vm1135_vm4 = vmor %vm527_vm13, %vm528_vm14  ;;  %vm507_vm8 = vweird.f32 %v1061_v49 }
 0x2b8   :  { %v454_v27 = vmul.f32 %v434_v9, %v929_v33  ;;  %v523_v38 = vmul.f32 %v1066_v20, %v522_v26  ;;  %v472_v24 = vmul.f32 %v1077_v30, %v1055_v15  ;;  %v500_v11 = vsel %vm1109_vm12, %v1057_v63, %v496_v62  ;;  %vm1159_vm7 = vmor %vm487_vm15, %vm488_vm1 }
 0x2b9   :  { %v431_v22 = vpop.xlane.xlu0 %430  ;;  %v483_v35 = vmul.f32 %v1074_v56, %v482_v44  ;;  %vm478_vm5 = vweird.f32 %v1077_v30  ;;  %v593_v62 = vmul.f32 %v500_v11, %v933_v37 }
 0x2ba   :  { %v453_v28 = vmul.f32 %v431_v22, %v929_v33  ;;  %v1079_v21 = vpop.eup %716  ;;  %v1085_v40 = vadd.f32 1e-05, %v454_v27  ;;  %v524_v51 = vmul.f32 0.5, %v523_v38  ;;  %v473_v55 = vmul.f32 %v1077_v30, %v472_v24  ;;  %vm1170_vm10 = vmor %vm477_vm2, %vm478_vm5 }
 0x2bb   :  { %v512_v31 = vmul.f32 %v1079_v21, %v1059_v16  ;;  %v484_v54 = vmul.f32 0.5, %v483_v35  ;;  %vm518_vm6 = vweird.f32 %v1079_v21 }
 0x2bc   :  { %v1082_v34 = vpop.eup %718  ;;  %v1089_v43 = vadd.f32 1e-05, %v453_v28  ;;  %720 = vrsqrt.f32 %v1085_v40  ;;  %v525_v0 = vsub.f32 1.5, %v524_v51  ;;  %v474_v60 = vmul.f32 0.5, %v473_v55  ;;  %vm1185_vm11 = vmor %vm517_vm3, %vm518_vm6 }
 0x2bd   :  { %v502_v45 = vmul.f32 %v1082_v34, %v1061_v49  ;;  %v513_v57 = vmul.f32 %v1079_v21, %v512_v31  ;;  %v485_v28 = vsub.f32 1.5, %v484_v54  ;;  %vm508_vm9 = vweird.f32 %v1082_v34 }
 0x2be   :  { %722 = vrsqrt.f32 %v1089_v43  ;;  %v526_v12 = vmul.f32 %v1066_v20, %v525_v0  ;;  %v475_v22 = vsub.f32 1.5, %v474_v60  ;;  %vm1190_vm12 = vmor %vm507_vm8, %vm508_vm9  ;;  %vm547_vm13 = vweird.f32 %v1085_v40 }
 0x2bf   :  { %v437_v23 = vpop.xlane.xlu1 %436  ;;  %v503_v59 = vmul.f32 %v1082_v34, %v502_v45  ;;  %v514_v7 = vmul.f32 0.5, %v513_v57  ;;  %v486_v49 = vmul.f32 %v1074_v56, %v485_v28  ;;  %vm537_vm15 = vweird.f32 %v1089_v43 }
 0x2c0   :  { %v455_v32 = vmul.f32 %v437_v23, %v929_v33  ;;  %v530_v31 = vsel %vm1135_vm4, %v1066_v20, %v526_v12  ;;  %v476_v48 = vmul.f32 %v1077_v30, %v475_v22 }
 0x2c1   :  { %v504_v46 = vmul.f32 0.5, %v503_v59  ;;  %v1200_v16 = vmul.f32 %v530_v31, %v940_v42 }
 0x2c2   :  { %v1097_v47 = vadd.f32 1e-05, %v455_v32  ;;  %v1113_v3 = vpop.eup %720  ;;  %v515_v32 = vsub.f32 1.5, %v514_v7  ;;  %v480_v2 = vsel %vm1170_vm10, %v1077_v30, %v476_v48 }
 0x2c3   :  { %v542_v25 = vmul.f32 %v1113_v3, %v1085_v40  ;;  %v505_v36 = vsub.f32 1.5, %v504_v46  ;;  %v490_v46 = vsel %vm1159_vm7, %v1074_v56, %v486_v49  ;;  %v591_v63 = vmul.f32 %v480_v2, %v966_v1 }
 0x2c4   :  { %724 = vrsqrt.f32 %v1097_v47  ;;  %v1117_v4 = vpop.eup %722  ;;  %v516_v55 = vmul.f32 %v1079_v21, %v515_v32  ;;  %vm548_vm14 = vweird.f32 %v1113_v3  ;;  %vm557_vm3 = vweird.f32 %v1097_v47 }
 0x2c5   :  { %v532_v26 = vmul.f32 %v1117_v4, %v1089_v43  ;;  %v543_v14 = vmul.f32 %v1113_v3, %v542_v25  ;;  %v506_v35 = vmul.f32 %v1082_v34, %v505_v36  ;;  %vm538_vm1 = vweird.f32 %v1117_v4  ;;  %vm1244_vm2 = vmor %vm547_vm13, %vm548_vm14 }
 0x2c6   :  { %v520_v37 = vsel %vm1185_vm11, %v1079_v21, %v516_v55  ;;  %v603_v45 = vadd.f32 %v593_v62, %v591_v63  ;;  %vm1253_vm5 = vmor %vm537_vm15, %vm538_vm1  ;;  %v297_v2 = vperm.slane %v814_v6, 4 }
 0x2c7   :  { %v446_v53 = vpop.xlane.xlu1 %445  ;;  %v533_v51 = vmul.f32 %v1117_v4, %v532_v26  ;;  %v544_v60 = vmul.f32 0.5, %v543_v14  ;;  %v510_v42 = vsel %vm1190_vm12, %v1082_v34, %v506_v35  ;;  %v595_v28 = vmul.f32 %v520_v37, %v977_v8 }
 0x2c8   :  { %v458_v58 = vmul.f32 %v446_v53, %v929_v33 }
 0x2c9   :  { %v534_v54 = vmul.f32 0.5, %v533_v51  ;;  %v545_v25 = vsub.f32 1.5, %v544_v60  ;;  %v605_v51 = vadd.f32 %v603_v45, %v595_v28 }
 0x2ca   :  { %v1119_v9 = vadd.f32 1e-05, %v458_v58  ;;  %v1126_v18 = vpop.eup %724 }
 0x2cb   :  { %v552_v38 = vmul.f32 %v1126_v18, %v1097_v47  ;;  %v535_v26 = vsub.f32 1.5, %v534_v54  ;;  %v546_v8 = vmul.f32 %v1113_v3, %v545_v25  ;;  %vm558_vm4 = vweird.f32 %v1126_v18  ;;  %v29_v47 = vld [vmem:[%s1364_s1 + $0x10] sm:$0xff] }
 0x2cc   :  { %726 = vrsqrt.f32 %v1119_v9  ;;  %vm587_vm6 = vweird.f32 %v1119_v9  ;;  %vm1260_vm8 = vmor %vm557_vm3, %vm558_vm4 }
 0x2cd   :  { %v553_v59 = vmul.f32 %v1126_v18, %v552_v38  ;;  %v592_v38 = vmul.f32 %v490_v46, %v961_v61  ;;  %v536_v48 = vmul.f32 %v1117_v4, %v535_v26  ;;  %v550_v62 = vsel %vm1244_vm2, %v1113_v3, %v546_v8 }
 0x2ce   :  { %v300_v3 = vperm.slane %v814_v6, 5 }
 0x2cf   :  { %v554_v12 = vmul.f32 0.5, %v553_v59 }
 0x2d1   :  { %v555_v36 = vsub.f32 1.5, %v554_v12 }
 0x2d2   :  { %v1196_v58 = vpop.eup %726 }
 0x2d3   :  { %v582_v22 = vmul.f32 %v1196_v58, %v1119_v9  ;;  %v556_v55 = vmul.f32 %v1126_v18, %v555_v36  ;;  %vm588_vm14 = vweird.f32 %v1196_v58  ;;  %v23_v9 = vld [vmem:[%s1363_s0] sm:$0xff] }
 0x2d4   :  { %vm1291_vm2 = vmor %vm587_vm6, %vm588_vm14  ;;  %vm668_vm14 = vcmask 8192  }
 0x312   :  { %v270_v23 = vpop.xlane.xlu0 %269 }
 0x313   :  { %v272_v27 = vmul.f32 %v270_v23, %v929_v33 }
 0x314   :  { %v267_v5 = vpop.xlane.xlu2 %266 }
 0x315   :  { %v1149_v24 = vadd.f32 1e-05, %v272_v27  ;;  %v271_v44 = vmul.f32 %v267_v5, %v929_v33  ;;  %v583_v5 = vmul.f32 %v1196_v58, %v582_v22 }
 0x317   :  { %728 = vrsqrt.f32 %v1149_v24  ;;  %v1177_v53 = vadd.f32 1e-05, %v271_v44  ;;  %v584_v15 = vmul.f32 0.5, %v583_v5  ;;  %vm291_vm10 = vweird.f32 %v1149_v24 }
 0x319   :  { %730 = vrsqrt.f32 %v1177_v53  ;;  %vm281_vm12 = vweird.f32 %v1177_v53  ;;  %v585_v46 = vsub.f32 1.5, %v584_v15  ;;  %v25_v15 = vld [vmem:[%s1363_s0 + $0x10] sm:$0xff] }
 0x31a   :  { %v443_v0 = vpop.xlane.xlu0 %442 }
 0x31b   :  { %v457_v7 = vmul.f32 %v443_v0, %v929_v33  ;;  %v540_v0 = vsel %vm1253_vm5, %v1117_v4, %v536_v48  ;;  %v560_v4 = vsel %vm1260_vm8, %v1126_v18, %v556_v55 }
 0x31c   :  { %v440_v11 = vpop.xlane.xlu2 %439  ;;  %v597_v22 = vmul.f32 %v540_v0, %v996_v19 }
 0x31d   :  { %v1216_v30 = vpop.eup %728  ;;  %v1220_v23 = vadd.f32 1e-05, %v457_v7  ;;  %v456_v56 = vmul.f32 %v440_v11, %v929_v33  ;;  %v594_v33 = vmul.f32 %v510_v42, %v982_v10 }
 0x31e   :  { %v286_v21 = vmul.f32 %v1216_v30, %v1149_v24  ;;  %vm292_vm7 = vweird.f32 %v1216_v30  ;;  %v607_v26 = vadd.f32 %v605_v51, %v597_v22 }
 0x31f   :  { %v731_v34 = vpop.eup %730  ;;  %732 = vrsqrt.f32 %v1220_v23  ;;  %v1229_v27 = vadd.f32 1e-05, %v456_v56  ;;  %v604_v40 = vadd.f32 %v594_v33, %v592_v38  ;;  %vm293_vm11 = vmor %vm291_vm10, %vm292_vm7  ;;  %v598_v56 = vmul.f32 %v550_v62, %v991_v17 }
 0x320   :  { %v287_v1 = vmul.f32 %v1216_v30, %v286_v21  ;;  %v276_v32 = vmul.f32 %v731_v34, %v1177_v53  ;;  %vm282_vm9 = vweird.f32 %v731_v34  ;;  %vm577_vm1 = vweird.f32 %v1220_v23 }
 0x321   :  { %734 = vrsqrt.f32 %v1229_v27  ;;  %vm283_vm13 = vmor %vm281_vm12, %vm282_vm9  ;;  %v599_v21 = vmul.f32 %v560_v4, %v1004_v13  ;;  %vm567_vm5 = vweird.f32 %v1229_v27  ;;  %vm59_vm7 = vcmask 7168  }
 0x322   :  { %v288_v44 = vmul.f32 0.5, %v287_v1  ;;  %v277_v31 = vmul.f32 %v731_v34, %v276_v32  ;;  %v27_v1 = vld [vmem:[%s1364_s1] sm:$0xff] }
 0x323   :  { %v609_v5 = vadd.f32 %v607_v26, %v599_v21  ;;  %v31_v10 = vsub.f32 %v23_v9, %v27_v1  ;;  %v54_v9 = vld [vmem:[%s1365_s2 + $0x18] sm:$0xff] }
 0x324   :  { %v289_v20 = vsub.f32 1.5, %v288_v44  ;;  %v278_v14 = vmul.f32 0.5, %v277_v31 }
 0x325   :  { %v733_v49 = vpop.eup %732 }
 0x326   :  { %v290_v43 = vmul.f32 %v1216_v30, %v289_v20  ;;  %v279_v35 = vsub.f32 1.5, %v278_v14  ;;  %v572_v57 = vmul.f32 %v733_v49, %v1220_v23  ;;  %vm578_vm15 = vweird.f32 %v733_v49  ;;  %v24_v20 = vld [vmem:[%s1363_s0 + $0x8] sm:$0xff] }
 0x327   :  { %v735_v59 = vpop.eup %734  ;;  %vm579_vm4 = vmor %vm577_vm1, %vm578_vm15  ;;  %v606_v23 = vadd.f32 %v604_v40, %v1200_v16  ;;  %v35_v40 = vmul.f32 %v31_v10, %v31_v10 }
 0x328   :  { %v280_v60 = vmul.f32 %v731_v34, %v279_v35  ;;  %v573_v54 = vmul.f32 %v733_v49, %v572_v57  ;;  %v562_v7 = vmul.f32 %v735_v59, %v1229_v27  ;;  %v294_v37 = vsel %vm293_vm11, %v1216_v30, %v290_v43 }
 0x329   :  { %v296_v11 = vmul.f32 %v294_v37, %v1019_v39  ;;  %v586_v39 = vmul.f32 %v1196_v58, %v585_v46  ;;  %vm568_vm3 = vweird.f32 %v735_v59  ;;  %v608_v44 = vadd.f32 %v606_v23, %v598_v56  ;;  %v52_v56 = vld [vmem:[%s1365_s2 + $0x8] sm:$0xff] }
 0x32a   :  { %v574_v24 = vmul.f32 0.5, %v573_v54  ;;  %v563_v42 = vmul.f32 %v735_v59, %v562_v7  ;;  %v284_v12 = vsel %vm283_vm13, %v731_v34, %v280_v60  ;;  %vm569_vm6 = vmor %vm567_vm5, %vm568_vm3 }
 0x32b   :  { %v295_v53 = vmul.f32 %v284_v12, %v1022_v41  ;;  %v299_v63 = vmul.f32 %v297_v2, %v296_v11  ;;  %v590_v27 = vsel %vm1291_vm2, %v1196_v58, %v586_v39  ;;  %v28_v58 = vld [vmem:[%s1364_s1 + $0x8] sm:$0xff]  ;;  %v51_v12 = vld [vmem:[%s1365_s2] sm:$0xff] }
 0x32c   :  { %v575_v30 = vsub.f32 1.5, %v574_v24  ;;  %v564_v6 = vmul.f32 0.5, %v563_v42 }
 0x32d   :  { %v298_v18 = vmul.f32 %v297_v2, %v295_v53  ;;  %v302_v17 = vadd.f32 %v300_v3, %v299_v63  ;;  %v78_v63 = vsel %vm59_vm7, %v52_v56, 0.0 }
 0x32e   :  { %v565_v19 = vsub.f32 1.5, %v564_v6  ;;  %v576_v41 = vmul.f32 %v733_v49, %v575_v30  ;;  %v77_v6 = vsel %vm59_vm7, %v51_v12, 0.0 }
 0x32f   :  { %v301_v25 = vadd.f32 %v300_v3, %v298_v18  ;;  %v304_v13 = vmax.f32 %v302_v17, 0.0  ;;  %v79_v26 = vadd.f32 %v78_v63, %v77_v6 }
 0x330   :  { %v566_v28 = vmul.f32 %v735_v59, %v565_v19  ;;  %v580_v33 = vsel %vm579_vm4, %v733_v49, %v576_v41  ;;  %v26_v49 = vld [vmem:[%s1363_s0 + $0x18] sm:$0xff] }
 0x331   :  { %v303_v32 = vmax.f32 %v301_v25, 0.0  ;;  %v601_v36 = vmul.f32 %v580_v33, %v1032_v50  ;;  %v308_v16 = vsel %vm126_vm0, %v304_v13, -inf  ;;  %v602_v50 = vmul.f32 %v590_v27, %v1012_v29  ;;  %v30_v29 = vld [vmem:[%s1364_s1 + $0x18] sm:$0xff]  ;;  %v53_v25 = vld [vmem:[%s1365_s2 + $0x10] sm:$0xff] }
 0x332   :  { %v570_v38 = vsel %vm569_vm6, %v735_v59, %v566_v28  ;;  %309 = vmax.xlane.f32.xlu0 %v308_v16  ;;  %v34_v35 = vsub.f32 %v26_v49, %v30_v29  ;;  %v33_v59 = vsub.f32 %v25_v15, %v29_v47  ;;  %v80_v23 = vsel %vm59_vm7, %v53_v25, 0.0 }
 0x333   :  { %v305_v31 = vsel %vm126_vm0, %v303_v32, -inf  ;;  %v611_v45 = vadd.f32 %v609_v5, %v601_v36  ;;  %v600_v8 = vmul.f32 %v570_v38, %v1036_v52  ;;  %v32_v52 = vsub.f32 %v24_v20, %v28_v58 }
 0x334   :  { %306 = vmax.xlane.f32.xlu2 %v305_v31  ;;  %v38_v62 = vmul.f32 %v34_v35, %v34_v35  ;;  %v37_v0 = vmul.f32 %v33_v59, %v33_v59  ;;  %v81_v27 = vadd.f32 %v80_v23, %v79_v26  ;;  %v82_v31 = vsel %vm59_vm7, %v54_v9, 0.0 }
 0x335   :  { %v613_v48 = vmul.f32 0.16666667, %v611_v45  ;;  %v610_v61 = vadd.f32 %v608_v44, %v600_v8  ;;  %v36_v57 = vmul.f32 %v32_v52, %v32_v52 }
 0x337   :  { %v615_v14 = vsel %vm126_vm0, %v613_v48, -inf  ;;  %v612_v51 = vadd.f32 %v610_v61, %v602_v50  ;;  %v83_v50 = vadd.f32 %v82_v31, %v81_v27 }
 0x338   :  { %616 = vmax.xlane.f32.xlu1 %v615_v14 }
 0x339   :  { %v614_v55 = vmul.f32 0.16666667, %v612_v51 }
 0x33a   :  { %39 = vadd.xlane.f32.xlu0 %v35_v40 }
 0x33b   :  { %v618_v43 = vsel %vm126_vm0, %v614_v55, -inf }
 0x33c   :  { %619 = vmax.xlane.f32.xlu2 %v618_v43 }
 0x340   :  { %41 = vadd.xlane.f32.xlu1 %v36_v57 }
 0x342   :  { %45 = vadd.xlane.f32.xlu0 %v38_v62 }
 0x344   :  { %43 = vadd.xlane.f32.xlu2 %v37_v0 }
 0x3a5   :  { %v310_v2 = vpop.xlane.xlu0 %309 }
 0x3a6   :  { %v312_v60 = vsub.f32 %v304_v13, %v310_v2 }
 0x3a7   :  { %v307_v54 = vpop.xlane.xlu2 %306 }
 0x3a8   :  { %v311_v7 = vsub.f32 %v303_v32, %v307_v54  ;;  %v315_v46 = vmul.f32 1.442695, %v312_v60 }
 0x3aa   :  { %v313_v37 = vmul.f32 1.442695, %v311_v7  ;;  %736 = vpow2.f32 %v315_v46 }
 0x3ab   :  { %v617_v3 = vpop.xlane.xlu1 %616 }
 0x3ac   :  { %738 = vpow2.f32 %v313_v37  ;;  %v621_v4 = vsub.f32 %v613_v48, %v617_v3 }
 0x3ad   :  { %v40_v42 = vpop.xlane.xlu0 %39 }
 0x3ae   :  { %v623_v24 = vmul.f32 1.442695, %v621_v4  ;;  %v47_v53 = vmul.f32 0.008928572, %v40_v42 }
 0x3af   :  { %v620_v11 = vpop.xlane.xlu2 %619 }
 0x3b0   :  { %740 = vpow2.f32 %v623_v24  ;;  %v622_v22 = vsub.f32 %v614_v55, %v620_v11  ;;  %v737_v30 = vpop.eup %736  ;;  %v55_v34 = vmul.f32 %v51_v12, %v47_v53 }
 0x3b1   :  { %v320_v39 = vsel %vm126_vm0, %v737_v30, 0.0 }
 0x3b2   :  { %v739_v18 = vpop.eup %738  ;;  %v625_v21 = vmul.f32 1.442695, %v622_v22  ;;  %321 = vadd.xlane.f32.xlu2 %v320_v39  ;;  %v60_v13 = vsel %vm59_vm7, %v55_v34, 0.0 }
 0x3b3   :  { %v317_v19 = vsel %vm126_vm0, %v739_v18, 0.0  ;;  %v42_v17 = vpop.xlane.xlu1 %41 }
 0x3b4   :  { %742 = vpow2.f32 %v625_v21  ;;  %318 = vadd.xlane.f32.xlu1 %v317_v19  ;;  %v48_v41 = vmul.f32 0.008928572, %v42_v17 }
 0x3b5   :  { %v46_v1 = vpop.xlane.xlu0 %45 }
 0x3b6   :  { %v741_v28 = vpop.eup %740  ;;  %v56_v33 = vmul.f32 %v52_v56, %v48_v41  ;;  %v50_v5 = vmul.f32 0.008928572, %v46_v1 }
 0x3b7   :  { %v627_v32 = vsel %vm126_vm0, %v741_v28, 0.0  ;;  %v44_v36 = vpop.xlane.xlu2 %43 }
 0x3b8   :  { %628 = vadd.xlane.f32.xlu0 %v627_v32  ;;  %v61_v16 = vsel %vm59_vm7, %v56_v33, 0.0  ;;  %v49_v38 = vmul.f32 0.008928572, %v44_v36  ;;  %v58_v44 = vmul.f32 %v54_v9, %v50_v5 }
 0x3b9   :  { %v62_v45 = vadd.f32 %v61_v16, %v60_v13 }
 0x3ba   :  { %v743_v8 = vpop.eup %742  ;;  %v57_v10 = vmul.f32 %v53_v25, %v49_v38  ;;  %v65_v20 = vsel %vm59_vm7, %v58_v44, 0.0 }
 0x3bb   :  { %v630_v48 = vsel %vm126_vm0, %v743_v8, 0.0 }
 0x3bc   :  { %631 = vadd.xlane.f32.xlu1 %v630_v48  ;;  %v63_v61 = vsel %vm59_vm7, %v57_v10, 0.0  ;;  %v663_v10 = vlaneseq }
 0x3bd   :  { %v64_v58 = vadd.f32 %v63_v61, %v62_v45 }
 0x3be   :  { %v664_v61 = vand.u32 127, %v663_v10 }
 0x3bf   :  { %v66_v14 = vadd.f32 %v65_v20, %v64_v58 }
 0x3c0   :  { %84 = vadd.xlane.f32.xlu0 %v83_v50  ;;  %vm665_vm13 = vcmp.eq.s32.totalorder %v664_v61, 0 }
 0x3c1   :  { %67 = vadd.xlane.f32.xlu2 %v66_v14 }
 0x425   :  { %v322_v40 = vpop.xlane.xlu2 %321 }
 0x427   :  { %v319_v51 = vpop.xlane.xlu1 %318 }
 0x428   :  { %744 = vrcp.f32 %v319_v51 }
 0x42b   :  { %v629_v52 = vpop.xlane.xlu0 %628 }
 0x42c   :  { %746 = vrcp.f32 %v629_v52 }
 0x42d   :  { %748 = vrcp.f32 %v322_v40 }
 0x42e   :  { %v745_v29 = vpop.eup %744 }
 0x42f   :  { %v632_v49 = vpop.xlane.xlu1 %631  ;;  %v325_v47 = vmul.f32 %v745_v29, %v739_v18 }
 0x430   :  { %750 = vrcp.f32 %v632_v49 }
 0x432   :  { %v747_v55 = vpop.eup %746 }
 0x433   :  { %v749_v15 = vpop.eup %748  ;;  %v635_v43 = vmul.f32 %v747_v55, %v741_v28  ;;  %v85_v35 = vpop.xlane.xlu0 %84 }
 0x434   :  { %v68_v57 = vpop.xlane.xlu2 %67  ;;  %v86_v59 = vrot.slane %v85_v35, 4  ;;  %v326_v60 = vmul.f32 %v749_v15, %v737_v30 }
 0x435   :  { %v637_v62 = vsub.f32 %v325_v47, %v635_v43  ;;  %v69_v0 = vrot.slane %v68_v57, 4 }
 0x436   :  { %v751_v2 = vpop.eup %750  ;;  %v87_v54 = vadd.f32 %v86_v59, %v85_v35 }
 0x437   :  { %v636_v7 = vmul.f32 %v751_v2, %v743_v8  ;;  %v639_v46 = vand.u32 2147483647, %v637_v62  ;;  %v643_v37 = vmul.f32 0.25, %v637_v62  ;;  %v70_v3 = vadd.f32 %v69_v0, %v68_v57 }
 0x438   :  { %v88_v4 = vrot.slane %v87_v54, 2 }
 0x439   :  { %v638_v24 = vsub.f32 %v326_v60, %v636_v7  ;;  %v645_v42 = vmul.f32 %v643_v37, %v637_v62  ;;  %v678_v11 = vadd.f32 -1.0, %v639_v46  ;;  %vm641_vm8 = vcmp.lt.f32.partialorder %v639_v46, 2.0 }
 0x43a   :  { %v71_v12 = vrot.slane %v70_v3, 2  ;;  %v89_v53 = vadd.f32 %v88_v4, %v87_v54 }
 0x43b   :  { %v640_v22 = vand.u32 2147483647, %v638_v24  ;;  %v644_v56 = vmul.f32 0.25, %v638_v24  ;;  %v649_v30 = vsel %vm641_vm8, %v645_v42, %v678_v11 }
 0x43c   :  { %v72_v6 = vadd.f32 %v71_v12, %v70_v3  ;;  %v90_v63 = vrot.slane %v89_v53, 1  ;;  %v651_v17 = vsel %vm126_vm0, %v649_v30, 0.0 }
 0x43d   :  { %vm642_vm9 = vcmp.lt.f32.partialorder %v640_v22, 2.0  ;;  %v646_v18 = vmul.f32 %v644_v56, %v638_v24  ;;  %v679_v21 = vadd.f32 -1.0, %v640_v22 }
 0x43e   :  { %v73_v39 = vrot.slane %v72_v6, 1  ;;  %v91_v19 = vadd.f32 %v90_v63, %v89_v53 }
 0x43f   :  { %v650_v34 = vsel %vm642_vm9, %v646_v18, %v679_v21 }
 0x440   :  { %v652_v41 = vsel %vm126_vm0, %v650_v34, 0.0  ;;  %v74_v25 = vadd.f32 %v73_v39, %v72_v6 }
 0x441   :  { %v653_v26 = vadd.f32 %v652_v41, %v651_v17 }
 0x442   :  { %692 = vpush %v74_v25 }
 0x443   :  { %654 = vadd.xlane.f32.xlu1 %v653_v26  ;;  %694 = vpush %v91_v19 }
 0x473   :  { %s693_s2 = spop %692 }
 0x474   :  { %s695_s19 = spop %694  ;;  %v76_v20 = vstv %s693_s2 }
 0x475   :  { %v93_v36 = vstv %s695_s19 }
 0x476   :  { %v94_v5 = vmax.f32 %v93_v36, 1.0 }
 0x478   :  { %752 = vrcp.f32 %v94_v5  ;;  %vm100_vm0 = vweird.f32 %v94_v5  ;;  %v106_v31 = vand.u32 2147483648, %v94_v5  ;;  %v104_v8 = vand.u32 2147483647, %v94_v5 }
 0x47a   :  { %v107_v48 = vor.u32 1.1754944e-38, %v106_v31  ;;  %vm105_vm12 = vcmp.eq.f32.partialorder %v104_v8, 8.507059e+37 }
 0x47e   :  { %v753_v16 = vpop.eup %752 }
 0x47f   :  { %v96_v38 = vmul.f32 %v753_v16, %v94_v5  ;;  %vm101_vm10 = vweird.f32 %v753_v16 }
 0x480   :  { %vm102_vm11 = vmor %vm100_vm0, %vm101_vm10 }
 0x481   :  { %v97_v27 = vsub.f32 1.0, %v96_v38 }
 0x483   :  { %v98_v44 = vmul.f32 %v753_v16, %v97_v27 }
 0x485   :  { %v99_v45 = vadd.f32 %v753_v16, %v98_v44 }
 0x487   :  { %v103_v50 = vsel %vm102_vm11, %v753_v16, %v99_v45 }
 0x488   :  { %v108_v58 = vsel %vm105_vm12, %v107_v48, %v103_v50 }
 0x489   :  { %v109_v14 = vmul.f32 %v108_v58, %v76_v20 }
 0x4b6   :  { %v655_v23 = vpop.xlane.xlu1 %654 }
 0x4b7   :  { %v656_v28 = vrot.slane %v655_v23, 4 }
 0x4b9   :  { %v657_v13 = vadd.f32 %v656_v28, %v655_v23 }
 0x4bb   :  { %v658_v33 = vrot.slane %v657_v13, 2 }
 0x4bd   :  { %v659_v9 = vadd.f32 %v658_v33, %v657_v13 }
 0x4bf   :  { %v660_v1 = vrot.slane %v659_v9, 1 }
 0x4c1   :  { %v661_v32 = vadd.f32 %v660_v1, %v659_v9 }
 0x4c3   :  { %696 = vpush %v661_v32 }
 0x4f4   :  { %s697_s20 = spop %696 }
 0x4f5   :  { %v666_v51 = vstv %s697_s20 }
 0x4f6   :  { %v667_v40 = vsel %vm665_vm13, %v109_v14, %v666_v51 }
 0x4f7   :  { %669 = vst.msk [vmem:[%s1366_s6] sm:$0x1] %vm668_vm14, %v667_v40 }

</bundles_post_ra>
